<compile_context>
chip_gen: v6e
topology: v6e:2x2x1
jax: 0.10.0
libtpu: 0.0.40
codegen_flags: <defaults>
</compile_context>

<pallas_src>
import functools
import math

import jax
import jax.numpy as jnp
from jax.experimental import pallas as pl
from jax.experimental.pallas import tpu as pltpu


def _softplus(x):
    # numerically stable softplus
    return jnp.log1p(jnp.exp(-jnp.abs(x))) + jnp.maximum(x, 0.0)


def cnp_kernel(
    x_all_ref, yc_ref, pool_ref, expand_ref,
    # x_encoder MLP: Linear(x_dim, xh) -> ReLU -> Linear(xh, xe)  (weights stored (out, in))
    xw0_ref, xb0_ref, xw1_ref, xb1_ref,
    # encoder MLP (first Linear split into x-part / y-part row blocks)
    ew0x_ref, ew0y_ref, eb0_ref, ew1_ref, eb1_ref,
    # decoder MLP (first Linear split into embedding-part / x-part row blocks,
    # last Linear split into mean / cov row blocks)
    dw0e_ref, dw0x_ref, db0_ref,
    dw1m_ref, db1m_ref, dw1c_ref, db1c_ref,
    mean_ref, cov_ref,
    *, ncols_c, min_cov,
):
    f32 = jnp.float32

    def dot(a, b):
        return jnp.dot(a, b, preferred_element_type=f32)

    x_all = x_all_ref[0]            # (x_dim, TB*(Nc+Nt))  context cols first
    yc = yc_ref[0]                  # (c_dim, TB*Nc)

    # ---- shared x-encoder: ONE wide pass over context+target columns
    h = jnp.maximum(dot(xw0_ref[...], x_all) + xb0_ref[...], 0.0)
    xe_all = dot(xw1_ref[...], h) + xb1_ref[...]       # (xe, TB*(Nc+Nt))
    xe_c = xe_all[:, :ncols_c]                         # (xe, TB*Nc) lane-aligned split
    xe_t = xe_all[:, ncols_c:]                         # (xe, TB*Nt)

    # ---- encoder (concat-free) + per-batch mean via precomputed pooling matmul
    h = jnp.maximum(dot(ew0x_ref[...], xe_c)
                    + dot(ew0y_ref[...], yc) + eb0_ref[...], 0.0)
    enc = dot(ew1_ref[...], h) + eb1_ref[...]          # (E, TB*Nc)
    emb = dot(enc, pool_ref[...])                      # (E, TB)

    # ---- decoder (concat-free); embedding broadcast via precomputed expand matmul
    emb_t = dot(dot(dw0e_ref[...], emb), expand_ref[...])   # (dh, TB*Nt)
    h2 = jnp.maximum(emb_t + dot(dw0x_ref[...], xe_t) + db0_ref[...], 0.0)

    # lane-dense stores; softplus only on the covariance rows
    mean_ref[0] = dot(dw1m_ref[...], h2) + db1m_ref[...]
    cov_ref[0] = _softplus(dot(dw1c_ref[...], h2) + db1c_ref[...]) + min_cov


def _num_parallel_blocks():
    # 2 TensorCores per chip on v7x -> prefer 2 parallel blocks; else 1 big block.
    try:
        kind = jax.devices()[0].device_kind.lower()
        return 2 if ("v7" in kind or "7x" in kind) else 1
    except Exception:
        return 1


def _pick_batch_tile(B, Nc, Nt, n_blocks_target):
    # smallest TB such that TB*Nc % 128 == 0 and TB*Nt % 128 == 0
    align_c = 128 // math.gcd(Nc, 128)
    align_t = 128 // math.gcd(Nt, 128)
    align = (align_c * align_t) // math.gcd(align_c, align_t)
    tb = -(-B // n_blocks_target)            # ceil(B / target blocks)
    tb = -(-tb // align) * align             # round up to lane alignment
    # cap TB (~64) so the O(TB^2) pool/expand matmuls stay cheap
    cap = max(align, (64 // align) * align) if align <= 64 else align
    return min(tb, cap)


def init_params(key, x_dim, context_dim, embedding_dim, prediction_dim,
                x_hidden, enc_hidden, dec_hidden):
    ks = jax.random.split(key, 8)
    s = 0.2
    xe = x_hidden  # x_encoder output dim == its hidden dim (hidden_dims[-1])
    p = {
        "xw0": s * jax.random.normal(ks[0], (x_dim, x_hidden), jnp.float32),
        "xb0": jnp.zeros((x_hidden,), jnp.float32),
        "xw1": s * jax.random.normal(ks[1], (x_hidden, xe), jnp.float32),
        "xb1": jnp.zeros((xe,), jnp.float32),
        "ew0": s * jax.random.normal(ks[2], (xe + context_dim, enc_hidden), jnp.float32),
        "eb0": jnp.zeros((enc_hidden,), jnp.float32),
        "ew1": s * jax.random.normal(ks[3], (enc_hidden, embedding_dim), jnp.float32),
        "eb1": jnp.zeros((embedding_dim,), jnp.float32),
        "dw0": s * jax.random.normal(ks[4], (embedding_dim + xe, dec_hidden), jnp.float32),
        "db0": jnp.zeros((dec_hidden,), jnp.float32),
        "dw1": s * jax.random.normal(ks[5], (dec_hidden, 2 * prediction_dim), jnp.float32),
        "db1": jnp.zeros((2 * prediction_dim,), jnp.float32),
    }
    return p


def cnp_forward(params, X_context, Y_context, X_target, *, prediction_dim, min_cov,
                batch_tile=None):
    f32 = jnp.float32
    B, Nc, x_dim = X_context.shape
    _, _, c_dim = Y_context.shape
    _, Nt, _ = X_target.shape
    xe = params["xw1"].shape[1]
    E = params["ew1"].shape[1]
    d = prediction_dim

    if batch_tile is None:
        TB = _pick_batch_tile(B, Nc, Nt, _num_parallel_blocks())
    else:
        TB = batch_tile
    n_blocks = pl.cdiv(B, TB)
    B_pad = n_blocks * TB

    def to_lanes(X):
        # (B, N, F) -> (n_blocks, F, TB*N); columns ordered (batch-in-tile, point)
        _, N, F = X.shape
        Xp = jnp.pad(X.astype(f32), ((0, B_pad - B), (0, 0), (0, 0)))
        X4 = Xp.reshape(n_blocks, TB, N, F)
        return jnp.transpose(X4, (0, 3, 1, 2)).reshape(n_blocks, F, TB * N)

    Xc_T = to_lanes(X_context)
    Yc_T = to_lanes(Y_context)
    Xt_T = to_lanes(X_target)
    # single slab for the shared x-encoder pass: context columns first, target after
    X_all = jnp.concatenate([Xc_T, Xt_T], axis=2)      # (n_blocks, x_dim, TB*(Nc+Nt))

    # grid-invariant 0/1 selection matrices (precomputed once, constant index maps)
    pool = (jnp.arange(TB * Nc)[:, None] // Nc
            == jnp.arange(TB)[None, :]).astype(f32) * (1.0 / Nc)       # (TB*Nc, TB)
    expand = (jnp.arange(TB)[:, None]
              == jnp.arange(TB * Nt)[None, :] // Nt).astype(f32)       # (TB, TB*Nt)

    # weights -> (out, in); split concat-weights into row blocks, dw1 into mean/cov blocks
    T = jnp.transpose
    col = lambda v: v.reshape(-1, 1)
    ew0x, ew0y = params["ew0"][:xe], params["ew0"][xe:]
    dw0e, dw0x = params["dw0"][:E], params["dw0"][E:]
    dw1, db1 = params["dw1"], params["db1"]
    consts = [
        pool, expand,
        T(params["xw0"]), col(params["xb0"]), T(params["xw1"]), col(params["xb1"]),
        T(ew0x), T(ew0y), col(params["eb0"]), T(params["ew1"]), col(params["eb1"]),
        T(dw0e), T(dw0x), col(params["db0"]),
        T(dw1[:, :d]), col(db1[:d]), T(dw1[:, d:]), col(db1[d:]),
    ]

    def cspec(arr):
        nd = arr.ndim
        return pl.BlockSpec(arr.shape, lambda b, _n=nd: (0,) * _n)

    kernel = functools.partial(cnp_kernel, ncols_c=TB * Nc, min_cov=min_cov)

    mean_t, cov_t = pl.pallas_call(
        kernel,
        out_shape=(jax.ShapeDtypeStruct((n_blocks, d, TB * Nt), f32),
                   jax.ShapeDtypeStruct((n_blocks, d, TB * Nt), f32)),
        grid_spec=pltpu.PrefetchScalarGridSpec(
            num_scalar_prefetch=0,
            grid=(n_blocks,),
            in_specs=[
                pl.BlockSpec((1, x_dim, TB * (Nc + Nt)), lambda b: (b, 0, 0)),
                pl.BlockSpec((1, c_dim, TB * Nc), lambda b: (b, 0, 0)),
            ] + [cspec(w) for w in consts],
            out_specs=[pl.BlockSpec((1, d, TB * Nt), lambda b: (b, 0, 0)),
                       pl.BlockSpec((1, d, TB * Nt), lambda b: (b, 0, 0))],
        ),
        compiler_params=pltpu.CompilerParams(dimension_semantics=("parallel",)),
    )(X_all, Yc_T, *consts)

    # (n_blocks, d, TB*Nt) -> (B, Nt, d): layout plumbing outside the kernel.
    def from_lanes(o):
        o = o.reshape(n_blocks, d, TB, Nt)
        return jnp.transpose(o, (0, 2, 3, 1)).reshape(B_pad, Nt, d)[:B]

    means = from_lanes(mean_t)
    diag = from_lanes(cov_t)                       # already softplus(...) + min_cov
    covs = diag[..., :, None] * jnp.eye(d, dtype=f32)
    return means, covs


def cnp_reference(params, Xc, Yc, Xt, *, prediction_dim, min_cov):
    d = prediction_dim

    def mlp2(x, w0, b0, w1, b1):
        return jnp.maximum(x @ w0 + b0, 0.0) @ w1 + b1

    xe_c = mlp2(Xc, params["xw0"], params["xb0"], params["xw1"], params["xb1"])
    enc = mlp2(jnp.concatenate([xe_c, Yc], -1),
               params["ew0"], params["eb0"], params["ew1"], params["eb1"])
    emb = enc.mean(axis=-2, keepdims=True)
    xe_t = mlp2(Xt, params["xw0"], params["xb0"], params["xw1"], params["xb1"])
    emb_exp = jnp.broadcast_to(emb, (Xt.shape[0], Xt.shape[1], emb.shape[-1]))
    dec = mlp2(jnp.concatenate([emb_exp, xe_t], -1),
               params["dw0"], params["db0"], params["dw1"], params["db1"])
    means = dec[..., :d]
    covs = _softplus(dec[..., d:])[..., :, None] * jnp.eye(d, dtype=dec.dtype)
    covs = covs + jnp.eye(d, dtype=dec.dtype) * min_cov
    return means, covs


if __name__ == "__main__":
    # small, CNP-shaped problem; lane-aligned tiling pads B=8 up to TB=16
    # (TB*Nc = 128 lanes, TB*Nt = 256 lanes)
    B, Nc, Nt = 8, 8, 16
    x_dim, context_dim = 2, 2
    embedding_dim, prediction_dim = 32, 2
    x_hidden, enc_hidden, dec_hidden = 32, 64, 64
    min_cov = 1e-3

    key = jax.random.PRNGKey(0)
    kp, kx, ky, kt = jax.random.split(key, 4)
    params = init_params(kp, x_dim, context_dim, embedding_dim, prediction_dim,
                         x_hidden, enc_hidden, dec_hidden)
    X_context = jax.random.normal(kx, (B, Nc, x_dim), jnp.float32)
    Y_context = jax.random.normal(ky, (B, Nc, context_dim), jnp.float32)
    X_target = jax.random.normal(kt, (B, Nt, x_dim), jnp.float32)

    means, covs = cnp_forward(params, X_context, Y_context, X_target,
                              prediction_dim=prediction_dim, min_cov=min_cov)
    jax.block_until_ready((means, covs))

    means_ref, covs_ref = cnp_reference(params, X_context, Y_context, X_target,
                                        prediction_dim=prediction_dim, min_cov=min_cov)
    assert means.shape == (B, Nt, prediction_dim)
    assert covs.shape == (B, Nt, prediction_dim, prediction_dim)
    assert jnp.allclose(means, means_ref, rtol=2e-4, atol=2e-4)
    assert jnp.allclose(covs, covs_ref, rtol=2e-4, atol=2e-4)
    print("KERNEL_OK")
</pallas_src>

<mosaic_0001>
module attributes {stable_mosaic.version = 11 : i64} {
  func.func @cnp_kernel(%arg0: i32, %arg1: memref<1x2x384xf32, #tpu.memory_space<vmem>>, %arg2: memref<1x2x128xf32, #tpu.memory_space<vmem>>, %arg3: memref<128x16xf32, #tpu.memory_space<vmem>>, %arg4: memref<16x256xf32, #tpu.memory_space<vmem>>, %arg5: memref<32x2xf32, #tpu.memory_space<vmem>>, %arg6: memref<32x1xf32, #tpu.memory_space<vmem>>, %arg7: memref<32x32xf32, #tpu.memory_space<vmem>>, %arg8: memref<32x1xf32, #tpu.memory_space<vmem>>, %arg9: memref<64x32xf32, #tpu.memory_space<vmem>>, %arg10: memref<64x2xf32, #tpu.memory_space<vmem>>, %arg11: memref<64x1xf32, #tpu.memory_space<vmem>>, %arg12: memref<32x64xf32, #tpu.memory_space<vmem>>, %arg13: memref<32x1xf32, #tpu.memory_space<vmem>>, %arg14: memref<64x32xf32, #tpu.memory_space<vmem>>, %arg15: memref<64x32xf32, #tpu.memory_space<vmem>>, %arg16: memref<64x1xf32, #tpu.memory_space<vmem>>, %arg17: memref<2x64xf32, #tpu.memory_space<vmem>>, %arg18: memref<2x1xf32, #tpu.memory_space<vmem>>, %arg19: memref<2x64xf32, #tpu.memory_space<vmem>>, %arg20: memref<2x1xf32, #tpu.memory_space<vmem>>, %arg21: memref<1x2x256xf32, #tpu.memory_space<vmem>>, %arg22: memref<1x2x256xf32, #tpu.memory_space<vmem>>) attributes {dimension_semantics = [#tpu.dimension_semantics<parallel>], iteration_bounds = array<i64: 1>, scalar_prefetch = 0 : i64, scratch_operands = 0 : i64, tpu.core_type = #tpu.core_type<tc>, window_params = [{transform_indices = @transform_0, window_bounds = array<i64: 1, 2, 384>}, {transform_indices = @transform_1, window_bounds = array<i64: 1, 2, 128>}, {pipeline_mode = #tpu.pipeline_mode<synchronous>, transform_indices = @transform_2, window_bounds = array<i64: 128, 16>}, {pipeline_mode = #tpu.pipeline_mode<synchronous>, transform_indices = @transform_3, window_bounds = array<i64: 16, 256>}, {pipeline_mode = #tpu.pipeline_mode<synchronous>, transform_indices = @transform_4, window_bounds = array<i64: 32, 2>}, {pipeline_mode = #tpu.pipeline_mode<synchronous>, transform_indices = @transform_5, window_bounds = array<i64: 32, 1>}, {pipeline_mode = #tpu.pipeline_mode<synchronous>, transform_indices = @transform_6, window_bounds = array<i64: 32, 32>}, {pipeline_mode = #tpu.pipeline_mode<synchronous>, transform_indices = @transform_7, window_bounds = array<i64: 32, 1>}, {pipeline_mode = #tpu.pipeline_mode<synchronous>, transform_indices = @transform_8, window_bounds = array<i64: 64, 32>}, {pipeline_mode = #tpu.pipeline_mode<synchronous>, transform_indices = @transform_9, window_bounds = array<i64: 64, 2>}, {pipeline_mode = #tpu.pipeline_mode<synchronous>, transform_indices = @transform_10, window_bounds = array<i64: 64, 1>}, {pipeline_mode = #tpu.pipeline_mode<synchronous>, transform_indices = @transform_11, window_bounds = array<i64: 32, 64>}, {pipeline_mode = #tpu.pipeline_mode<synchronous>, transform_indices = @transform_12, window_bounds = array<i64: 32, 1>}, {pipeline_mode = #tpu.pipeline_mode<synchronous>, transform_indices = @transform_13, window_bounds = array<i64: 64, 32>}, {pipeline_mode = #tpu.pipeline_mode<synchronous>, transform_indices = @transform_14, window_bounds = array<i64: 64, 32>}, {pipeline_mode = #tpu.pipeline_mode<synchronous>, transform_indices = @transform_15, window_bounds = array<i64: 64, 1>}, {pipeline_mode = #tpu.pipeline_mode<synchronous>, transform_indices = @transform_16, window_bounds = array<i64: 2, 64>}, {pipeline_mode = #tpu.pipeline_mode<synchronous>, transform_indices = @transform_17, window_bounds = array<i64: 2, 1>}, {pipeline_mode = #tpu.pipeline_mode<synchronous>, transform_indices = @transform_18, window_bounds = array<i64: 2, 64>}, {pipeline_mode = #tpu.pipeline_mode<synchronous>, transform_indices = @transform_19, window_bounds = array<i64: 2, 1>}, {transform_indices = @transform_20, window_bounds = array<i64: 1, 2, 256>}, {transform_indices = @transform_21, window_bounds = array<i64: 1, 2, 256>}]} {
    %c0 = arith.constant 0 : index
    %c0_0 = arith.constant 0 : index
    %c0_1 = arith.constant 0 : index
    %0 = vector.load %arg1[%c0, %c0_0, %c0_1] : memref<1x2x384xf32, #tpu.memory_space<vmem>>, vector<1x2x384xf32>
    %1 = vector.shape_cast %0 : vector<1x2x384xf32> to vector<2x384xf32>
    %c0_2 = arith.constant 0 : index
    %c0_3 = arith.constant 0 : index
    %c0_4 = arith.constant 0 : index
    %2 = vector.load %arg2[%c0_2, %c0_3, %c0_4] : memref<1x2x128xf32, #tpu.memory_space<vmem>>, vector<1x2x128xf32>
    %3 = vector.shape_cast %2 : vector<1x2x128xf32> to vector<2x128xf32>
    %c0_5 = arith.constant 0 : index
    %c0_6 = arith.constant 0 : index
    %4 = vector.load %arg5[%c0_5, %c0_6] : memref<32x2xf32, #tpu.memory_space<vmem>>, vector<32x2xf32>
    %cst = arith.constant dense<0.000000e+00> : vector<32x384xf32>
    %5 = tpu.matmul %4, %1, %cst {dimension_numbers = #tpu.dot_dimension_numbers<[1], [0], [0], [1], [0, 0, 1, 1], [], []>} : vector<32x2xf32>, vector<2x384xf32>, vector<32x384xf32> -> vector<32x384xf32>
    %c0_7 = arith.constant 0 : index
    %c0_8 = arith.constant 0 : index
    %6 = vector.load %arg6[%c0_7, %c0_8] : memref<32x1xf32, #tpu.memory_space<vmem>>, vector<32x1xf32>
    %7 = vector.broadcast %6 : vector<32x1xf32> to vector<32x384xf32>
    %8 = arith.addf %5, %7 : vector<32x384xf32>
    %cst_9 = arith.constant 0.000000e+00 : f32
    %9 = vector.broadcast %cst_9 : f32 to vector<32x384xf32>
    %10 = arith.maximumf %8, %9 : vector<32x384xf32>
    %c0_10 = arith.constant 0 : index
    %c0_11 = arith.constant 0 : index
    %11 = vector.load %arg7[%c0_10, %c0_11] : memref<32x32xf32, #tpu.memory_space<vmem>>, vector<32x32xf32>
    %cst_12 = arith.constant dense<0.000000e+00> : vector<32x384xf32>
    %12 = tpu.matmul %11, %10, %cst_12 {dimension_numbers = #tpu.dot_dimension_numbers<[1], [0], [0], [1], [0, 0, 1, 1], [], []>} : vector<32x32xf32>, vector<32x384xf32>, vector<32x384xf32> -> vector<32x384xf32>
    %c0_13 = arith.constant 0 : index
    %c0_14 = arith.constant 0 : index
    %13 = vector.load %arg8[%c0_13, %c0_14] : memref<32x1xf32, #tpu.memory_space<vmem>>, vector<32x1xf32>
    %14 = vector.broadcast %13 : vector<32x1xf32> to vector<32x384xf32>
    %15 = arith.addf %12, %14 : vector<32x384xf32>
    %16 = vector.extract_strided_slice %15 {offsets = [0, 0], sizes = [32, 128], strides = [1, 1]} : vector<32x384xf32> to vector<32x128xf32>
    %17 = vector.extract_strided_slice %15 {offsets = [0, 128], sizes = [32, 256], strides = [1, 1]} : vector<32x384xf32> to vector<32x256xf32>
    %c0_15 = arith.constant 0 : index
    %c0_16 = arith.constant 0 : index
    %18 = vector.load %arg9[%c0_15, %c0_16] : memref<64x32xf32, #tpu.memory_space<vmem>>, vector<64x32xf32>
    %cst_17 = arith.constant dense<0.000000e+00> : vector<64x128xf32>
    %19 = tpu.matmul %18, %16, %cst_17 {dimension_numbers = #tpu.dot_dimension_numbers<[1], [0], [0], [1], [0, 0, 1, 1], [], []>} : vector<64x32xf32>, vector<32x128xf32>, vector<64x128xf32> -> vector<64x128xf32>
    %c0_18 = arith.constant 0 : index
    %c0_19 = arith.constant 0 : index
    %20 = vector.load %arg10[%c0_18, %c0_19] : memref<64x2xf32, #tpu.memory_space<vmem>>, vector<64x2xf32>
    %cst_20 = arith.constant dense<0.000000e+00> : vector<64x128xf32>
    %21 = tpu.matmul %20, %3, %cst_20 {dimension_numbers = #tpu.dot_dimension_numbers<[1], [0], [0], [1], [0, 0, 1, 1], [], []>} : vector<64x2xf32>, vector<2x128xf32>, vector<64x128xf32> -> vector<64x128xf32>
    %22 = arith.addf %19, %21 : vector<64x128xf32>
    %c0_21 = arith.constant 0 : index
    %c0_22 = arith.constant 0 : index
    %23 = vector.load %arg11[%c0_21, %c0_22] : memref<64x1xf32, #tpu.memory_space<vmem>>, vector<64x1xf32>
    %24 = vector.broadcast %23 : vector<64x1xf32> to vector<64x128xf32>
    %25 = arith.addf %22, %24 : vector<64x128xf32>
    %cst_23 = arith.constant 0.000000e+00 : f32
    %26 = vector.broadcast %cst_23 : f32 to vector<64x128xf32>
    %27 = arith.maximumf %25, %26 : vector<64x128xf32>
    %c0_24 = arith.constant 0 : index
    %c0_25 = arith.constant 0 : index
    %28 = vector.load %arg12[%c0_24, %c0_25] : memref<32x64xf32, #tpu.memory_space<vmem>>, vector<32x64xf32>
    %cst_26 = arith.constant dense<0.000000e+00> : vector<32x128xf32>
    %29 = tpu.matmul %28, %27, %cst_26 {dimension_numbers = #tpu.dot_dimension_numbers<[1], [0], [0], [1], [0, 0, 1, 1], [], []>} : vector<32x64xf32>, vector<64x128xf32>, vector<32x128xf32> -> vector<32x128xf32>
    %c0_27 = arith.constant 0 : index
    %c0_28 = arith.constant 0 : index
    %30 = vector.load %arg13[%c0_27, %c0_28] : memref<32x1xf32, #tpu.memory_space<vmem>>, vector<32x1xf32>
    %31 = vector.broadcast %30 : vector<32x1xf32> to vector<32x128xf32>
    %32 = arith.addf %29, %31 : vector<32x128xf32>
    %c0_29 = arith.constant 0 : index
    %c0_30 = arith.constant 0 : index
    %33 = vector.load %arg3[%c0_29, %c0_30] : memref<128x16xf32, #tpu.memory_space<vmem>>, vector<128x16xf32>
    %cst_31 = arith.constant dense<0.000000e+00> : vector<32x16xf32>
    %34 = tpu.matmul %32, %33, %cst_31 {dimension_numbers = #tpu.dot_dimension_numbers<[1], [0], [0], [1], [0, 0, 1, 1], [], []>} : vector<32x128xf32>, vector<128x16xf32>, vector<32x16xf32> -> vector<32x16xf32>
    %c0_32 = arith.constant 0 : index
    %c0_33 = arith.constant 0 : index
    %35 = vector.load %arg14[%c0_32, %c0_33] : memref<64x32xf32, #tpu.memory_space<vmem>>, vector<64x32xf32>
    %cst_34 = arith.constant dense<0.000000e+00> : vector<64x16xf32>
    %36 = tpu.matmul %35, %34, %cst_34 {dimension_numbers = #tpu.dot_dimension_numbers<[1], [0], [0], [1], [0, 0, 1, 1], [], []>} : vector<64x32xf32>, vector<32x16xf32>, vector<64x16xf32> -> vector<64x16xf32>
    %c0_35 = arith.constant 0 : index
    %c0_36 = arith.constant 0 : index
    %37 = vector.load %arg4[%c0_35, %c0_36] : memref<16x256xf32, #tpu.memory_space<vmem>>, vector<16x256xf32>
    %cst_37 = arith.constant dense<0.000000e+00> : vector<64x256xf32>
    %38 = tpu.matmul %36, %37, %cst_37 {dimension_numbers = #tpu.dot_dimension_numbers<[1], [0], [0], [1], [0, 0, 1, 1], [], []>} : vector<64x16xf32>, vector<16x256xf32>, vector<64x256xf32> -> vector<64x256xf32>
    %c0_38 = arith.constant 0 : index
    %c0_39 = arith.constant 0 : index
    %39 = vector.load %arg15[%c0_38, %c0_39] : memref<64x32xf32, #tpu.memory_space<vmem>>, vector<64x32xf32>
    %cst_40 = arith.constant dense<0.000000e+00> : vector<64x256xf32>
    %40 = tpu.matmul %39, %17, %cst_40 {dimension_numbers = #tpu.dot_dimension_numbers<[1], [0], [0], [1], [0, 0, 1, 1], [], []>} : vector<64x32xf32>, vector<32x256xf32>, vector<64x256xf32> -> vector<64x256xf32>
    %41 = arith.addf %38, %40 : vector<64x256xf32>
    %c0_41 = arith.constant 0 : index
    %c0_42 = arith.constant 0 : index
    %42 = vector.load %arg16[%c0_41, %c0_42] : memref<64x1xf32, #tpu.memory_space<vmem>>, vector<64x1xf32>
    %43 = vector.broadcast %42 : vector<64x1xf32> to vector<64x256xf32>
    %44 = arith.addf %41, %43 : vector<64x256xf32>
    %cst_43 = arith.constant 0.000000e+00 : f32
    %45 = vector.broadcast %cst_43 : f32 to vector<64x256xf32>
    %46 = arith.maximumf %44, %45 : vector<64x256xf32>
    %c0_44 = arith.constant 0 : index
    %c0_45 = arith.constant 0 : index
    %47 = vector.load %arg17[%c0_44, %c0_45] : memref<2x64xf32, #tpu.memory_space<vmem>>, vector<2x64xf32>
    %cst_46 = arith.constant dense<0.000000e+00> : vector<2x256xf32>
    %48 = tpu.matmul %47, %46, %cst_46 {dimension_numbers = #tpu.dot_dimension_numbers<[1], [0], [0], [1], [0, 0, 1, 1], [], []>} : vector<2x64xf32>, vector<64x256xf32>, vector<2x256xf32> -> vector<2x256xf32>
    %c0_47 = arith.constant 0 : index
    %c0_48 = arith.constant 0 : index
    %49 = vector.load %arg18[%c0_47, %c0_48] : memref<2x1xf32, #tpu.memory_space<vmem>>, vector<2x1xf32>
    %50 = vector.broadcast %49 : vector<2x1xf32> to vector<2x256xf32>
    %51 = arith.addf %48, %50 : vector<2x256xf32>
    %c0_49 = arith.constant 0 : index
    %c0_50 = arith.constant 0 : index
    %c0_51 = arith.constant 0 : index
    %52 = vector.load %arg21[%c0_49, %c0_50, %c0_51] : memref<1x2x256xf32, #tpu.memory_space<vmem>>, vector<1x2x256xf32>
    %53 = vector.shape_cast %52 : vector<1x2x256xf32> to vector<2x256xf32>
    %54 = vector.shape_cast %51 : vector<2x256xf32> to vector<1x2x256xf32>
    tpu.vector_store %arg21[%c0_49, %c0_50, %c0_51], %54 {strides = array<i32>} : memref<1x2x256xf32, #tpu.memory_space<vmem>>, vector<1x2x256xf32>,
    %c0_52 = arith.constant 0 : index
    %c0_53 = arith.constant 0 : index
    %55 = vector.load %arg19[%c0_52, %c0_53] : memref<2x64xf32, #tpu.memory_space<vmem>>, vector<2x64xf32>
    %cst_54 = arith.constant dense<0.000000e+00> : vector<2x256xf32>
    %56 = tpu.matmul %55, %46, %cst_54 {dimension_numbers = #tpu.dot_dimension_numbers<[1], [0], [0], [1], [0, 0, 1, 1], [], []>} : vector<2x64xf32>, vector<64x256xf32>, vector<2x256xf32> -> vector<2x256xf32>
    %c0_55 = arith.constant 0 : index
    %c0_56 = arith.constant 0 : index
    %57 = vector.load %arg20[%c0_55, %c0_56] : memref<2x1xf32, #tpu.memory_space<vmem>>, vector<2x1xf32>
    %58 = vector.broadcast %57 : vector<2x1xf32> to vector<2x256xf32>
    %59 = arith.addf %56, %58 : vector<2x256xf32>
    %60 = math.absf %59 : vector<2x256xf32>
    %cst_57 = arith.constant 0.000000e+00 : f32
    %61 = vector.broadcast %cst_57 : f32 to vector<2x256xf32>
    %62 = arith.subf %61, %60 : vector<2x256xf32>
    %63 = math.exp %62 : vector<2x256xf32>
    %64 = math.log1p %63 : vector<2x256xf32>
    %cst_58 = arith.constant 0.000000e+00 : f32
    %65 = vector.broadcast %cst_58 : f32 to vector<2x256xf32>
    %66 = arith.maximumf %59, %65 : vector<2x256xf32>
    %67 = arith.addf %64, %66 : vector<2x256xf32>
    %cst_59 = arith.constant 1.000000e-03 : f32
    %68 = vector.broadcast %cst_59 : f32 to vector<2x256xf32>
    %69 = arith.addf %67, %68 : vector<2x256xf32>
    %c0_60 = arith.constant 0 : index
    %c0_61 = arith.constant 0 : index
    %c0_62 = arith.constant 0 : index
    %70 = vector.load %arg22[%c0_60, %c0_61, %c0_62] : memref<1x2x256xf32, #tpu.memory_space<vmem>>, vector<1x2x256xf32>
    %71 = vector.shape_cast %70 : vector<1x2x256xf32> to vector<2x256xf32>
    %72 = vector.shape_cast %69 : vector<2x256xf32> to vector<1x2x256xf32>
    tpu.vector_store %arg22[%c0_60, %c0_61, %c0_62], %72 {strides = array<i32>} : memref<1x2x256xf32, #tpu.memory_space<vmem>>, vector<1x2x256xf32>,
    return
  }
  func.func @transform_0(%arg0: i32) -> (i32, i32, i32) {
    %c0_i32 = arith.constant 0 : i32
    %c0_i32_0 = arith.constant 0 : i32
    %c0_i32_1 = arith.constant 0 : i32
    return %arg0, %c0_i32, %c0_i32_0 : i32, i32, i32
  }
  func.func @transform_1(%arg0: i32) -> (i32, i32, i32) {
    %c0_i32 = arith.constant 0 : i32
    %c0_i32_0 = arith.constant 0 : i32
    %c0_i32_1 = arith.constant 0 : i32
    return %arg0, %c0_i32, %c0_i32_0 : i32, i32, i32
  }
  func.func @transform_2(%arg0: i32) -> (i32, i32) {
    %c0_i32 = arith.constant 0 : i32
    %c0_i32_0 = arith.constant 0 : i32
    %c0_i32_1 = arith.constant 0 : i32
    return %c0_i32, %c0_i32_0 : i32, i32
  }
  func.func @transform_3(%arg0: i32) -> (i32, i32) {
    %c0_i32 = arith.constant 0 : i32
    %c0_i32_0 = arith.constant 0 : i32
    %c0_i32_1 = arith.constant 0 : i32
    return %c0_i32, %c0_i32_0 : i32, i32
  }
  func.func @transform_4(%arg0: i32) -> (i32, i32) {
    %c0_i32 = arith.constant 0 : i32
    %c0_i32_0 = arith.constant 0 : i32
    %c0_i32_1 = arith.constant 0 : i32
    return %c0_i32, %c0_i32_0 : i32, i32
  }
  func.func @transform_5(%arg0: i32) -> (i32, i32) {
    %c0_i32 = arith.constant 0 : i32
    %c0_i32_0 = arith.constant 0 : i32
    %c0_i32_1 = arith.constant 0 : i32
    return %c0_i32, %c0_i32_0 : i32, i32
  }
  func.func @transform_6(%arg0: i32) -> (i32, i32) {
    %c0_i32 = arith.constant 0 : i32
    %c0_i32_0 = arith.constant 0 : i32
    %c0_i32_1 = arith.constant 0 : i32
    return %c0_i32, %c0_i32_0 : i32, i32
  }
  func.func @transform_7(%arg0: i32) -> (i32, i32) {
    %c0_i32 = arith.constant 0 : i32
    %c0_i32_0 = arith.constant 0 : i32
    %c0_i32_1 = arith.constant 0 : i32
    return %c0_i32, %c0_i32_0 : i32, i32
  }
  func.func @transform_8(%arg0: i32) -> (i32, i32) {
    %c0_i32 = arith.constant 0 : i32
    %c0_i32_0 = arith.constant 0 : i32
    %c0_i32_1 = arith.constant 0 : i32
    return %c0_i32, %c0_i32_0 : i32, i32
  }
  func.func @transform_9(%arg0: i32) -> (i32, i32) {
    %c0_i32 = arith.constant 0 : i32
    %c0_i32_0 = arith.constant 0 : i32
    %c0_i32_1 = arith.constant 0 : i32
    return %c0_i32, %c0_i32_0 : i32, i32
  }
  func.func @transform_10(%arg0: i32) -> (i32, i32) {
    %c0_i32 = arith.constant 0 : i32
    %c0_i32_0 = arith.constant 0 : i32
    %c0_i32_1 = arith.constant 0 : i32
    return %c0_i32, %c0_i32_0 : i32, i32
  }
  func.func @transform_11(%arg0: i32) -> (i32, i32) {
    %c0_i32 = arith.constant 0 : i32
    %c0_i32_0 = arith.constant 0 : i32
    %c0_i32_1 = arith.constant 0 : i32
    return %c0_i32, %c0_i32_0 : i32, i32
  }
  func.func @transform_12(%arg0: i32) -> (i32, i32) {
    %c0_i32 = arith.constant 0 : i32
    %c0_i32_0 = arith.constant 0 : i32
    %c0_i32_1 = arith.constant 0 : i32
    return %c0_i32, %c0_i32_0 : i32, i32
  }
  func.func @transform_13(%arg0: i32) -> (i32, i32) {
    %c0_i32 = arith.constant 0 : i32
    %c0_i32_0 = arith.constant 0 : i32
    %c0_i32_1 = arith.constant 0 : i32
    return %c0_i32, %c0_i32_0 : i32, i32
  }
  func.func @transform_14(%arg0: i32) -> (i32, i32) {
    %c0_i32 = arith.constant 0 : i32
    %c0_i32_0 = arith.constant 0 : i32
    %c0_i32_1 = arith.constant 0 : i32
    return %c0_i32, %c0_i32_0 : i32, i32
  }
  func.func @transform_15(%arg0: i32) -> (i32, i32) {
    %c0_i32 = arith.constant 0 : i32
    %c0_i32_0 = arith.constant 0 : i32
    %c0_i32_1 = arith.constant 0 : i32
    return %c0_i32, %c0_i32_0 : i32, i32
  }
  func.func @transform_16(%arg0: i32) -> (i32, i32) {
    %c0_i32 = arith.constant 0 : i32
    %c0_i32_0 = arith.constant 0 : i32
    %c0_i32_1 = arith.constant 0 : i32
    return %c0_i32, %c0_i32_0 : i32, i32
  }
  func.func @transform_17(%arg0: i32) -> (i32, i32) {
    %c0_i32 = arith.constant 0 : i32
    %c0_i32_0 = arith.constant 0 : i32
    %c0_i32_1 = arith.constant 0 : i32
    return %c0_i32, %c0_i32_0 : i32, i32
  }
  func.func @transform_18(%arg0: i32) -> (i32, i32) {
    %c0_i32 = arith.constant 0 : i32
    %c0_i32_0 = arith.constant 0 : i32
    %c0_i32_1 = arith.constant 0 : i32
    return %c0_i32, %c0_i32_0 : i32, i32
  }
  func.func @transform_19(%arg0: i32) -> (i32, i32) {
    %c0_i32 = arith.constant 0 : i32
    %c0_i32_0 = arith.constant 0 : i32
    %c0_i32_1 = arith.constant 0 : i32
    return %c0_i32, %c0_i32_0 : i32, i32
  }
  func.func @transform_20(%arg0: i32) -> (i32, i32, i32) {
    %c0_i32 = arith.constant 0 : i32
    %c0_i32_0 = arith.constant 0 : i32
    %c0_i32_1 = arith.constant 0 : i32
    return %arg0, %c0_i32, %c0_i32_0 : i32, i32, i32
  }
  func.func @transform_21(%arg0: i32) -> (i32, i32, i32) {
    %c0_i32 = arith.constant 0 : i32
    %c0_i32_0 = arith.constant 0 : i32
    %c0_i32_1 = arith.constant 0 : i32
    return %arg0, %c0_i32, %c0_i32_0 : i32, i32, i32
  }
}

</mosaic_0001>

<bundles_post_ra>
// kernel: tpu_custom_call.1
= control target key start
LH: loop header
LB: loop body
LE: loop exit
PB: predicated region body
PF: predicated region fallthrough
CT: control target
= control target key end

     0   :  { %s2772_s0 = inlined_call_operand.vmem [shape: f32[1,2,384], index: 0, kind: input, shape index: {}]   ;;  %s2773_s1 = inlined_call_operand.vmem [shape: f32[1,2,128], index: 1, kind: input, shape index: {}]   ;;  %s2774_s2 = inlined_call_operand.vmem [shape: f32[128,16], index: 2, kind: input, shape index: {}]   ;;  %s2775_s3 = inlined_call_operand.vmem [shape: f32[16,256], index: 3, kind: input, shape index: {}]   ;;  %s2776_s4 = inlined_call_operand.vmem [shape: f32[32,2], index: 4, kind: input, shape index: {}]   ;;  %s2777_s5 = inlined_call_operand.vmem [shape: f32[32,1], index: 5, kind: input, shape index: {}]   ;;  %s2778_s6 = inlined_call_operand.vmem [shape: f32[32,32], index: 6, kind: input, shape index: {}]   ;;  %s2779_s7 = inlined_call_operand.vmem [shape: f32[32,1], index: 7, kind: input, shape index: {}]   ;;  %s2780_s8 = inlined_call_operand.vmem [shape: f32[64,32], index: 8, kind: input, shape index: {}]   ;;  %s2781_s9 = inlined_call_operand.vmem [shape: f32[64,2], index: 9, kind: input, shape index: {}]   ;;  %s2782_s10 = inlined_call_operand.vmem [shape: f32[64,1], index: 10, kind: input, shape index: {}]   ;;  %s2783_s11 = inlined_call_operand.vmem [shape: f32[32,64], index: 11, kind: input, shape index: {}]   ;;  %s2784_s12 = inlined_call_operand.vmem [shape: f32[32,1], index: 12, kind: input, shape index: {}]   ;;  %s2785_s13 = inlined_call_operand.vmem [shape: f32[64,32], index: 13, kind: input, shape index: {}]   ;;  %s2786_s14 = inlined_call_operand.vmem [shape: f32[64,32], index: 14, kind: input, shape index: {}]   ;;  %s2787_s15 = inlined_call_operand.vmem [shape: f32[64,1], index: 15, kind: input, shape index: {}]   ;;  %s2788_s16 = inlined_call_operand.vmem [shape: f32[2,64], index: 16, kind: input, shape index: {}]   ;;  %s2789_s17 = inlined_call_operand.vmem [shape: f32[2,1], index: 17, kind: input, shape index: {}]   ;;  %s2790_s18 = inlined_call_operand.vmem [shape: f32[2,64], index: 18, kind: input, shape index: {}]   ;;  %s2791_s19 = inlined_call_operand.vmem [shape: f32[2,1], index: 19, kind: input, shape index: {}]   ;;  %s2792_s20 = inlined_call_operand.hbm [shape: f32[1,2,256], index: 20, kind: output, shape index: {0}]   ;;  %s2793_s21 = inlined_call_operand.hbm [shape: f32[1,2,256], index: 21, kind: output, shape index: {1}]  }
   0x1   :  { %2798 = sst [smem:[#allocation8_spill]] %s2772_s0 }
   0x2   :  { %2799 = sst [smem:[#allocation9_spill]] %s2773_s1 }
   0x3   :  { %2800 = sst [smem:[#allocation10_spill]] %s2774_s2 }
   0x4   :  { %2801 = sst [smem:[#allocation11_spill]] %s2775_s3 }
   0x5   :  { %2802 = sst [smem:[#allocation12_spill]] %s2776_s4 }
   0x6   :  { %2803 = sst [smem:[#allocation13_spill]] %s2777_s5 }
   0x7   :  { %27 = vsyncpa [#allocation3], 0  ;;  %s2804_s26 = sld [smem:[#allocation8_spill]]  ;;  %v104_v1 = vlaneseq  ;;  %v2197_v3 = vmov 1983009808   ;;  %vm116_vm0 = vcmask 15360  }
   0x8   :  { %s2805_s28 = sld [smem:[#allocation12_spill]]  ;;  %v102_v4 = vunpack.c.l.s4 %v2197_v3  ;;  %v2198_v6 = vmov 0.0   ;;  %v2199_v11 = vmov 0   ;;  %vm129_vm1 = vcmask 1041408   ;;  %v329_v20 = vld [vmem:[%s2779_s7 + $0x18] sm:$0xff]  ;;  %v328_v21 = vld [vmem:[%s2779_s7 + $0x10] sm:$0xff] }
   0x9   :  { %v105_v5 = vshrl.u32 %v104_v1, 7  ;;  %200 = vmatprep.mubr.f32.mxu0 %v2198_v6  ;;  %s2806_s4 = sld [smem:[#allocation13_spill]]  ;;  %2142 = vset.pattern.permute.xlu0 %v2199_v11 }
   0xa   :  { %v103_v10 = vunpack.c.0.s8 %v102_v4  ;;  %2143 = vset.pattern.permute.xlu1 %v2199_v11 }
   0xc   :  { %v106_v12 = vsub.s32 %v103_v10, %v105_v5 }
   0xd   :  { %v69_v0 = vld [vmem:[%s2804_s26] sm:$0x3f] }
   0xe   :  { %v71_v2 = vld [vmem:[%s2805_s28] sm:$0xff]  ;;  %v100_v9 = vcombine.high %v69_v0, %v69_v0  ;;  %v107_v16 = vrot.slane %v69_v0, %v106_v12  ;;  %v72_v17 = vld [vmem:[%s2805_s28 + $0x8] sm:$0xff]  ;;  %v73_v19 = vld [vmem:[%s2805_s28 + $0x10] sm:$0xff] }
   0xf   :  { %2003 = vmatprep.mubr.msk.f32.mxu1 %vm116_vm0, %v71_v2  ;;  %v78_v7 = vld [vmem:[%s2806_s4 + $0x18] sm:$0xff]  ;;  %v76_v8 = vld [vmem:[%s2806_s4 + $0x8] sm:$0xff]  ;;  %v77_v13 = vld [vmem:[%s2806_s4 + $0x10] sm:$0xff] }
  0x10   :  { %96 = vperm.xlu0 %2142, %v78_v7   ;;  %86 = vperm.xlu1 %2143, %v76_v8   ;;  %v75_v14 = vld [vmem:[%s2806_s4] sm:$0xff]  ;;  %v114_v15 = vrot.slane %v100_v9, %v106_v12  ;;  %v115_v18 = vcombine.high %v107_v16, %v107_v16  ;;  %v74_v22 = vld [vmem:[%s2805_s28 + $0x18] sm:$0xff] }
  0x12   :  { %2001 = vmatprep.subr.msk.mxu1 %vm129_vm1, %v114_v15  ;;  %1855 = vmatprep.subr.msk.mxu0 %vm129_vm1, %v115_v18 }
  0x13   :  { %2002 = vmatpush3.msk.msra.mxu1 %vm129_vm1, %v114_v15  ;;  %1856 = vmatpush1.msk.msra.mxu0 %vm129_vm1, %v107_v16 }
  0x14   :  { %91 = vperm.xlu0 %2142, %v77_v13   ;;  %81 = vperm.xlu1 %2143, %v75_v14  }
  0x15   :  { %2004 = vmatmul.mubr.msk.f32.vlgmr.msra.gmra.mxu1 %vm116_vm0, %v72_v17 }
  0x16   :  { %2006 = vmatprep.mubr.msk.f32.mxu1 %vm116_vm0, %v73_v19 }
  0x17   :  { %28 = vsyncpa [#allocation5], 0  ;;  %1857 = vmatmul.mubr.msk.f32.vlgmr.msra.gmra.mxu0 %vm116_vm0, %v71_v2  ;;  %v327_v23 = vld [vmem:[%s2779_s7 + $0x8] sm:$0xff]  ;;  %v326_v24 = vld [vmem:[%s2779_s7] sm:$0xff]  ;;  %vm350_vm2 = vcmask 261120   ;;  %vm906_vm3 = vcmask 523264  }
  0x18   :  { %347 = vperm.xlu0 %2142, %v329_v20   ;;  %206 = vmatprep.mubr.f32.mxu0 %v2198_v6  ;;  %v821_v25 = vld [vmem:[%s2782_s10 + $0x38] sm:$0xff]  ;;  %v820_v26 = vld [vmem:[%s2782_s10 + $0x30] sm:$0xff]  ;;  %v819_v27 = vld [vmem:[%s2782_s10 + $0x28] sm:$0xff]  ;;  %s2809_s7 = sld [smem:[#allocation11_spill]]  ;;  %vm1391_vm4 = vcmask 130048  }
  0x19   :  { %342 = vperm.xlu1 %2143, %v328_v21   ;;  %2007 = vmatmul.mubr.msk.f32.gmra.mxu1 %vm116_vm0, %v74_v22  ;;  %v818_v28 = vld [vmem:[%s2782_s10 + $0x20] sm:$0xff]  ;;  %v817_v29 = vld [vmem:[%s2782_s10 + $0x18] sm:$0xff]  ;;  %v816_v30 = vld [vmem:[%s2782_s10 + $0x10] sm:$0xff] }
  0x1a   :  { %427 = vmatprep.mubr.f32.mxu1 %v2198_v6  ;;  %v815_v31 = vld [vmem:[%s2782_s10 + $0x8] sm:$0xff]  ;;  %v814_v32 = vld [vmem:[%s2782_s10] sm:$0xff]  ;;  %v884_v35 = vld [vmem:[%s2784_s12 + $0x10] sm:$0xff] }
  0x1b   :  { %1858 = vmatmul.mubr.msk.f32.gmra.mxu0 %vm116_vm0, %v72_v17  ;;  %v882_v33 = vld [vmem:[%s2784_s12] sm:$0xff]  ;;  %v883_v34 = vld [vmem:[%s2784_s12 + $0x8] sm:$0xff]  ;;  %v885_v36 = vld [vmem:[%s2784_s12 + $0x18] sm:$0xff]  ;;  %s2807_s12 = sld [smem:[#allocation9_spill]] }
  0x1c   :  { %337 = vperm.xlu0 %2142, %v327_v23   ;;  %212 = vmatprep.mubr.f32.mxu0 %v2198_v6  ;;  %v1536_v37 = vld [vmem:[%s2787_s15 + $0x38] sm:$0xff]  ;;  %v1535_v38 = vld [vmem:[%s2787_s15 + $0x30] sm:$0xff]  ;;  %v1534_v39 = vld [vmem:[%s2787_s15 + $0x28] sm:$0xff] }
  0x1d   :  { %332 = vperm.xlu1 %2143, %v326_v24   ;;  %v1533_v40 = vld [vmem:[%s2787_s15 + $0x20] sm:$0xff]  ;;  %v1532_v41 = vld [vmem:[%s2787_s15 + $0x18] sm:$0xff]  ;;  %v1531_v42 = vld [vmem:[%s2787_s15 + $0x10] sm:$0xff] }
  0x1e   :  { %v1530_v43 = vld [vmem:[%s2787_s15 + $0x8] sm:$0xff]  ;;  %v1529_v44 = vld [vmem:[%s2787_s15] sm:$0xff]  ;;  %v324_v9 = vld [vmem:[%s2778_s6 + $0x10] sm:$0xff]  ;;  %s2808_s15 = sld [smem:[#allocation10_spill]] }
  0x1f   :  { %1859 = vmatmul.mubr.msk.f32.gmra.mxu0 %vm116_vm0, %v73_v19  ;;  %v1703_v45 = vld [vmem:[%s2791_s19] sm:$0x3]  ;;  %v323_v8 = vld [vmem:[%s2778_s6 + $0x8] sm:$0xff]  ;;  %v325_v15 = vld [vmem:[%s2778_s6 + $0x18] sm:$0xff] }
  0x20   :  { %859 = vperm.xlu0 %2142, %v821_v25   ;;  %218 = vmatprep.mubr.f32.mxu0 %v2198_v6  ;;  %v1610_v46 = vld [vmem:[%s2789_s17] sm:$0x3] }
  0x21   :  { %854 = vperm.xlu1 %2143, %v820_v26   ;;  %v2437_v47 = vld [vmem:[%s2778_s6] sm:$0xff] }
  0x23   :  { %1860 = vmatmul.mubr.msk.f32.gmra.mxu0 %vm116_vm0, %v74_v22 }
  0x24   :  { %849 = vperm.xlu0 %2142, %v819_v27   ;;  %2017 = vmatprep.mubr.msk.f32.mxu0 %vm350_vm2, %v2437_v47 }
  0x25   :  { %844 = vperm.xlu1 %2143, %v818_v28   ;;  %v70_v28 = vld [vmem:[%s2807_s12] sm:$0x3] }
  0x28   :  { %839 = vperm.xlu0 %2142, %v817_v29   ;;  %v545_v29 = vld [vmem:[%s2781_s9] sm:$0xff] }
  0x29   :  { %834 = vperm.xlu1 %2143, %v816_v30   ;;  %v546_v30 = vld [vmem:[%s2781_s9 + $0x8] sm:$0xff] }
  0x2c   :  { %829 = vperm.xlu0 %2142, %v815_v31   ;;  %v537_v31 = vld [vmem:[%s2780_s8] sm:$0xff] }
  0x2d   :  { %824 = vperm.xlu1 %2143, %v814_v32   ;;  %v547_v32 = vld [vmem:[%s2781_s9 + $0x10] sm:$0xff] }
  0x30   :  { %888 = vperm.xlu0 %2142, %v882_v33   ;;  %v548_v33 = vld [vmem:[%s2781_s9 + $0x18] sm:$0xff] }
  0x31   :  { %893 = vperm.xlu1 %2143, %v883_v34   ;;  %v549_v34 = vld [vmem:[%s2781_s9 + $0x20] sm:$0xff] }
  0x34   :  { %898 = vperm.xlu0 %2142, %v884_v35   ;;  %v550_v35 = vld [vmem:[%s2781_s9 + $0x28] sm:$0xff] }
  0x35   :  { %903 = vperm.xlu1 %2143, %v885_v36   ;;  %v551_v36 = vld [vmem:[%s2781_s9 + $0x30] sm:$0xff] }
  0x38   :  { %1574 = vperm.xlu0 %2142, %v1536_v37   ;;  %v552_v37 = vld [vmem:[%s2781_s9 + $0x38] sm:$0xff] }
  0x39   :  { %1569 = vperm.xlu1 %2143, %v1535_v38  }
  0x3c   :  { %1564 = vperm.xlu0 %2142, %v1534_v39  }
  0x3d   :  { %1559 = vperm.xlu1 %2143, %v1533_v40  }
  0x40   :  { %1554 = vperm.xlu0 %2142, %v1532_v41  }
  0x41   :  { %1549 = vperm.xlu1 %2143, %v1531_v42  }
  0x44   :  { %1544 = vperm.xlu0 %2142, %v1530_v43  }
  0x45   :  { %1539 = vperm.xlu1 %2143, %v1529_v44  }
  0x48   :  { %1706 = vperm.xlu0 %2142, %v1703_v45  }
  0x49   :  { %1613 = vperm.xlu1 %2143, %v1610_v46  }
  0x8b   :  { %v97_v48 = vpop.permute.xlu0 %96  ;;  %v87_v49 = vpop.permute.xlu1 %86 }
  0x8f   :  { %v92_v55 = vpop.permute.xlu0 %91  ;;  %v82_v56 = vpop.permute.xlu1 %81 }
  0x93   :  { %v2506_v43 = vpop.permute.xlu0 %347 }
  0x94   :  { %v2510_v45 = vpop.permute.xlu1 %342 }
  0xd5   :  { %v2005_v50 = vpop.f32.mrf.mxu1 }
  0xd6   :  { %v297_v57 = vadd.f32 %v2005_v50, %v87_v49 }
  0xd7   :  { %v202_v51 = vpop.f32.mrf.mxu0  ;;  %v291_v52 = vpop.f32.mrf.mxu1 }
  0xd8   :  { %v292_v61 = vadd.f32 %v291_v52, %v82_v56  ;;  %v315_v1 = vmax.f32 %v297_v57, 0.0  ;;  %v203_v22 = vadd.f32 %v202_v51, %v82_v56  ;;  %v2517_v51 = vpop.permute.xlu1 %332  ;;  %v542_v57 = vld [vmem:[%s2780_s8 + $0x28] sm:$0xff] }
  0xd9   :  { %v204_v53 = vpop.f32.mrf.mxu0  ;;  %v2008_v54 = vpop.f32.mrf.mxu1 }
  0xda   :  { %v307_v58 = vadd.f32 %v2008_v54, %v97_v48  ;;  %v312_v4 = vmax.f32 %v292_v61, 0.0  ;;  %v205_v20 = vadd.f32 %v204_v53, %v82_v56  ;;  %v310_v27 = vmax.f32 %v203_v22, 0.0  ;;  %v538_v53 = vld [vmem:[%s2780_s8 + $0x8] sm:$0xff]  ;;  %v539_v54 = vld [vmem:[%s2780_s8 + $0x10] sm:$0xff]  ;;  %v541_v56 = vld [vmem:[%s2780_s8 + $0x20] sm:$0xff] }
  0xdb   :  { %v208_v59 = vpop.f32.mrf.mxu0  ;;  %v301_v60 = vpop.f32.mrf.mxu1  ;;  %v1019_v61 = vld [vmem:[%s2808_s15 + $0x78] sm:$0xff] }
  0xdc   :  { %v321_v62 = vmax.f32 %v307_v58, 0.0  ;;  %v302_v63 = vadd.f32 %v301_v60, %v92_v55  ;;  %v209_v18 = vadd.f32 %v208_v59, %v87_v49  ;;  %v311_v26 = vmax.f32 %v205_v20, 0.0  ;;  %v543_v58 = vld [vmem:[%s2780_s8 + $0x30] sm:$0xff]  ;;  %v544_v59 = vld [vmem:[%s2780_s8 + $0x38] sm:$0xff]  ;;  %v878_v60 = vld [vmem:[%s2783_s11] sm:$0xff] }
  0xdd   :  { %v210_v0 = vpop.f32.mrf.mxu0 }
  0xde   :  { %v318_v2 = vmax.f32 %v302_v63, 0.0  ;;  %2009 = vmatprep.subr.mxu0 %v321_v62  ;;  %v211_v16 = vadd.f32 %v210_v0, %v87_v49  ;;  %v313_v25 = vmax.f32 %v209_v18, 0.0  ;;  %v2514_v49 = vpop.permute.xlu0 %337  ;;  %v1017_v63 = vld [vmem:[%s2808_s15 + $0x68] sm:$0xff]  ;;  %v1016_v0 = vld [vmem:[%s2808_s15 + $0x60] sm:$0xff] }
  0xdf   :  { %v214_v3 = vpop.f32.mrf.mxu0  ;;  %2010 = vmatpush3.msra.mxu0 %v321_v62  ;;  %v1018_v62 = vld [vmem:[%s2808_s15 + $0x70] sm:$0xff] }
  0xe0   :  { %2011 = vmatprep.subr.mxu0 %v318_v2  ;;  %v215_v14 = vadd.f32 %v214_v3, %v92_v55  ;;  %v314_v24 = vmax.f32 %v211_v16, 0.0  ;;  %v1013_v3 = vld [vmem:[%s2808_s15 + $0x48] sm:$0xff] }
  0xe1   :  { %v216_v5 = vpop.f32.mrf.mxu0  ;;  %2012 = vmatpush3.msra.mxu0 %v318_v2  ;;  %v1014_v2 = vld [vmem:[%s2808_s15 + $0x50] sm:$0xff] }
  0xe2   :  { %2013 = vmatprep.subr.mxu0 %v315_v1  ;;  %v217_v12 = vadd.f32 %v216_v5, %v92_v55  ;;  %v316_v23 = vmax.f32 %v215_v14, 0.0  ;;  %v540_v55 = vld [vmem:[%s2780_s8 + $0x18] sm:$0xff] }
  0xe3   :  { %v220_v7 = vpop.f32.mrf.mxu0  ;;  %2014 = vmatpush3.msra.mxu0 %v315_v1  ;;  %v1015_v1 = vld [vmem:[%s2808_s15 + $0x58] sm:$0xff] }
  0xe4   :  { %2015 = vmatprep.subr.mxu0 %v312_v4  ;;  %v221_v10 = vadd.f32 %v220_v7, %v97_v48  ;;  %v317_v21 = vmax.f32 %v217_v12, 0.0  ;;  %v1011_v5 = vld [vmem:[%s2808_s15 + $0x38] sm:$0xff]  ;;  %v1010_v7 = vld [vmem:[%s2808_s15 + $0x30] sm:$0xff] }
  0xe5   :  { %v222_v11 = vpop.f32.mrf.mxu0  ;;  %2016 = vmatpush3.msra.mxu0 %v312_v4  ;;  %v1012_v4 = vld [vmem:[%s2808_s15 + $0x40] sm:$0xff] }
  0xe6   :  { %v223_v13 = vadd.f32 %v222_v11, %v97_v48  ;;  %2018 = vmatmul.mubr.msk.f32.vlgmr.msra.gmra.mxu0 %vm350_vm2, %v323_v8  ;;  %v319_v19 = vmax.f32 %v221_v10, 0.0  ;;  %2023 = vmatprep.subr.msk.mxu0 %vm129_vm1, %v70_v28  ;;  %v1007_v10 = vld [vmem:[%s2808_s15 + $0x18] sm:$0xff] }
  0xe7   :  { %2020 = vmatprep.mubr.msk.f32.mxu0 %vm350_vm2, %v324_v9  ;;  %2024 = vmatpush3.msk.msra.mxu0 %vm129_vm1, %v70_v28 }
  0xe8   :  { %v320_v17 = vmax.f32 %v223_v13, 0.0 }
  0xea   :  { %387 = vmatprep.subr.mxu1 %v320_v17  ;;  %2021 = vmatmul.mubr.msk.f32.gmra.mxu0 %vm350_vm2, %v325_v15 }
  0xeb   :  { %388 = vmatpush1.msra.mxu1 %v319_v19  ;;  %2025 = vmatprep.mubr.msk.f32.mxu0 %vm116_vm0, %v545_v29 }
  0xec   :  { %389 = vmatprep.subr.mxu1 %v317_v21 }
  0xed   :  { %390 = vmatpush1.msra.mxu1 %v316_v23 }
  0xee   :  { %391 = vmatprep.subr.mxu1 %v314_v24  ;;  %2026 = vmatmul.mubr.msk.f32.vlgmr.msra.gmra.mxu0 %vm116_vm0, %v546_v30  ;;  %v860_v24 = vpop.permute.xlu0 %859 }
  0xef   :  { %392 = vmatpush1.msra.mxu1 %v313_v25  ;;  %2028 = vmatprep.mubr.msk.f32.mxu0 %vm116_vm0, %v547_v32 }
  0xf0   :  { %393 = vmatprep.subr.mxu1 %v311_v26 }
  0xf1   :  { %394 = vmatpush1.msra.mxu1 %v310_v27  ;;  %v855_v27 = vpop.permute.xlu1 %854 }
  0xf2   :  { %1866 = vmatmul.mubr.msk.f32.vlgmr.msra.gmra.mxu1 %vm350_vm2, %v2437_v47  ;;  %2029 = vmatmul.mubr.msk.f32.gmra.mxu0 %vm116_vm0, %v548_v33 }
  0xf3   :  { %433 = vmatprep.mubr.f32.mxu1 %v2198_v6  ;;  %2031 = vmatprep.mubr.msk.f32.mxu0 %vm116_vm0, %v549_v34 }
  0xf5   :  { %v845_v33 = vpop.permute.xlu1 %844 }
  0xf6   :  { %1867 = vmatmul.mubr.msk.f32.gmra.mxu1 %vm350_vm2, %v323_v8  ;;  %2032 = vmatmul.mubr.msk.f32.gmra.mxu0 %vm116_vm0, %v550_v35  ;;  %v1009_v8 = vld [vmem:[%s2808_s15 + $0x28] sm:$0xff] }
  0xf7   :  { %439 = vmatprep.mubr.f32.mxu1 %v2198_v6  ;;  %2034 = vmatprep.mubr.msk.f32.mxu0 %vm116_vm0, %v551_v36 }
  0xfa   :  { %1868 = vmatmul.mubr.msk.f32.gmra.mxu1 %vm350_vm2, %v324_v9  ;;  %2035 = vmatmul.mubr.msk.f32.gmra.mxu0 %vm116_vm0, %v552_v37  ;;  %v1008_v9 = vld [vmem:[%s2808_s15 + $0x20] sm:$0xff] }
  0xfb   :  { %445 = vmatprep.mubr.f32.mxu1 %v2198_v6  ;;  %2073 = vmatprep.mubr.msk.f32.mxu0 %vm906_vm3, %v878_v60 }
  0xfe   :  { %1869 = vmatmul.mubr.msk.f32.gmra.mxu1 %vm350_vm2, %v325_v15 }
  0xff   :  { %2045 = vmatprep.mubr.msk.f32.mxu1 %vm350_vm2, %v537_v31  ;;  %v850_v31 = vpop.permute.xlu0 %849 }
 0x1a6   :  { %v2591_v11 = vpop.f32.mrf.mxu0 }
 0x1a8   :  { %v2593_v12 = vpop.f32.mrf.mxu0 }
 0x1aa   :  { %v2595_v13 = vpop.f32.mrf.mxu0 }
 0x1ac   :  { %v2597_v14 = vpop.f32.mrf.mxu0 }
 0x1ae   :  { %v2027_v15 = vpop.f32.mrf.mxu0 }
 0x1b0   :  { %v646_v16 = vpop.f32.mrf.mxu0 }
 0x1b2   :  { %v429_v38 = vpop.f32.mrf.mxu1  ;;  %v2030_v17 = vpop.f32.mrf.mxu0 }
 0x1b3   :  { %v430_v52 = vadd.f32 %v429_v38, %v2517_v51 }
 0x1b4   :  { %v2502_v39 = vpop.f32.mrf.mxu1  ;;  %v656_v19 = vpop.f32.mrf.mxu0 }
 0x1b6   :  { %v435_v40 = vpop.f32.mrf.mxu1  ;;  %v2033_v22 = vpop.f32.mrf.mxu0 }
 0x1b7   :  { %v436_v50 = vadd.f32 %v435_v40, %v2514_v49 }
 0x1b8   :  { %v2504_v41 = vpop.f32.mrf.mxu1  ;;  %v666_v26 = vpop.f32.mrf.mxu0 }
 0x1ba   :  { %v441_v42 = vpop.f32.mrf.mxu1  ;;  %v2036_v29 = vpop.f32.mrf.mxu0 }
 0x1bb   :  { %v442_v48 = vadd.f32 %v441_v42, %v2510_v45 }
 0x1bc   :  { %v2508_v44 = vpop.f32.mrf.mxu1  ;;  %v676_v36 = vpop.f32.mrf.mxu0 }
 0x1be   :  { %v447_v46 = vpop.f32.mrf.mxu1 }
 0x1bf   :  { %v448_v47 = vadd.f32 %v447_v46, %v2506_v43 }
 0x1c0   :  { %v2599_v18 = vpop.f32.mrf.mxu1 }
 0x1c1   :  { %2037 = vmatprep.subr.mxu1 %v448_v47 }
 0x1c2   :  { %2038 = vmatpush3.msra.mxu1 %v448_v47 }
 0x1c3   :  { %2039 = vmatprep.subr.mxu1 %v442_v48 }
 0x1c4   :  { %2040 = vmatpush3.msra.mxu1 %v442_v48 }
 0x1c5   :  { %2041 = vmatprep.subr.mxu1 %v436_v50 }
 0x1c6   :  { %2042 = vmatpush3.msra.mxu1 %v436_v50 }
 0x1c7   :  { %2043 = vmatprep.subr.mxu1 %v430_v52 }
 0x1c8   :  { %2044 = vmatpush3.msra.mxu1 %v430_v52  ;;  %v840_v52 = vpop.permute.xlu0 %839 }
 0x1c9   :  { %2046 = vmatmul.mubr.msk.f32.vlgmr.msra.gmra.mxu1 %vm350_vm2, %v538_v53  ;;  %2079 = vmatprep.subr.mxu1 %v1019_v61 }
 0x1ca   :  { %2048 = vmatprep.mubr.msk.f32.mxu1 %vm350_vm2, %v539_v54  ;;  %2080 = vmatpush3.msra.mxu1 %v1019_v61 }
 0x1cb   :  { %2081 = vmatprep.subr.mxu1 %v1018_v62 }
 0x1cc   :  { %2082 = vmatpush3.msra.mxu1 %v1018_v62 }
 0x1cd   :  { %2049 = vmatmul.mubr.msk.f32.gmra.mxu1 %vm350_vm2, %v540_v55  ;;  %2083 = vmatprep.subr.mxu1 %v1017_v63 }
 0x1ce   :  { %2051 = vmatprep.mubr.msk.f32.mxu1 %vm350_vm2, %v541_v56  ;;  %2084 = vmatpush3.msra.mxu1 %v1017_v63  ;;  %v835_v56 = vpop.permute.xlu1 %834  ;;  %v830_v63 = vpop.permute.xlu0 %829 }
 0x1cf   :  { %2085 = vmatprep.subr.mxu1 %v1016_v0 }
 0x1d0   :  { %2086 = vmatpush3.msra.mxu1 %v1016_v0 }
 0x1d1   :  { %2052 = vmatmul.mubr.msk.f32.gmra.mxu1 %vm350_vm2, %v542_v57  ;;  %2087 = vmatprep.subr.mxu1 %v1015_v1 }
 0x1d2   :  { %2054 = vmatprep.mubr.msk.f32.mxu1 %vm350_vm2, %v543_v58  ;;  %2088 = vmatpush3.msra.mxu1 %v1015_v1 }
 0x1d3   :  { %2089 = vmatprep.subr.mxu1 %v1014_v2 }
 0x1d4   :  { %2090 = vmatpush3.msra.mxu1 %v1014_v2  ;;  %v825_v2 = vpop.permute.xlu1 %824 }
 0x1d5   :  { %2055 = vmatmul.mubr.msk.f32.gmra.mxu1 %vm350_vm2, %v544_v59  ;;  %2091 = vmatprep.subr.mxu1 %v1013_v3 }
 0x1d6   :  { %2092 = vmatpush3.msra.mxu1 %v1013_v3 }
 0x1d7   :  { %2093 = vmatprep.subr.mxu1 %v1012_v4 }
 0x1d8   :  { %2094 = vmatpush3.msra.mxu1 %v1012_v4 }
 0x1d9   :  { %2095 = vmatprep.subr.mxu1 %v1011_v5 }
 0x1da   :  { %2096 = vmatpush3.msra.mxu1 %v1011_v5 }
 0x1db   :  { %2097 = vmatprep.subr.mxu1 %v1010_v7 }
 0x1dc   :  { %2098 = vmatpush3.msra.mxu1 %v1010_v7 }
 0x1dd   :  { %2099 = vmatprep.subr.mxu1 %v1009_v8 }
 0x1de   :  { %2100 = vmatpush3.msra.mxu1 %v1009_v8  ;;  %v879_v8 = vld [vmem:[%s2783_s11 + $0x8] sm:$0xff] }
 0x1df   :  { %2101 = vmatprep.subr.mxu1 %v1008_v9 }
 0x1e0   :  { %2102 = vmatpush3.msra.mxu1 %v1008_v9  ;;  %v880_v9 = vld [vmem:[%s2783_s11 + $0x10] sm:$0xff] }
 0x1e1   :  { %2103 = vmatprep.subr.mxu1 %v1007_v10 }
 0x1e2   :  { %2104 = vmatpush3.msra.mxu1 %v1007_v10  ;;  %v881_v10 = vld [vmem:[%s2783_s11 + $0x18] sm:$0xff] }
 0x289   :  { %v2047_v20 = vpop.f32.mrf.mxu1 }
 0x28a   :  { %v781_v57 = vadd.f32 %v2047_v20, %v2027_v15  ;;  %v1006_v15 = vld [vmem:[%s2808_s15 + $0x10] sm:$0xff] }
 0x28b   :  { %v775_v21 = vpop.f32.mrf.mxu1  ;;  %2105 = vmatprep.subr.mxu1 %v1006_v15 }
 0x28c   :  { %v776_v60 = vadd.f32 %v775_v21, %v646_v16  ;;  %v863_v0 = vadd.f32 %v830_v63, %v781_v57  ;;  %2106 = vmatpush3.msra.mxu1 %v1006_v15  ;;  %v1005_v16 = vld [vmem:[%s2808_s15 + $0x8] sm:$0xff]  ;;  %v894_v21 = vpop.permute.xlu1 %893  ;;  %v1253_v57 = vld [vmem:[%s2786_s14 + $0x38] sm:$0xff] }
 0x28d   :  { %v2050_v23 = vpop.f32.mrf.mxu1  ;;  %2107 = vmatprep.subr.mxu1 %v1005_v16 }
 0x28e   :  { %v791_v46 = vadd.f32 %v2050_v23, %v2030_v17  ;;  %v862_v3 = vadd.f32 %v825_v2, %v776_v60  ;;  %v871_v5 = vmax.f32 %v863_v0, 0.0  ;;  %2108 = vmatpush3.msra.mxu1 %v1005_v16  ;;  %v1004_v17 = vld [vmem:[%s2808_s15] sm:$0xff] }
 0x28f   :  { %v785_v25 = vpop.f32.mrf.mxu1  ;;  %2109 = vmatprep.subr.mxu1 %v1004_v17 }
 0x290   :  { %v786_v53 = vadd.f32 %v785_v25, %v656_v19  ;;  %v865_v58 = vadd.f32 %v840_v52, %v791_v46  ;;  %v870_v7 = vmax.f32 %v862_v3, 0.0  ;;  %2110 = vmatpush3.msra.mxu1 %v1004_v17  ;;  %v889_v19 = vpop.permute.xlu0 %888  ;;  %v529_v46 = vadd.f32 %v2597_v14, %v2510_v45  ;;  %v1109_v14 = vld [vmem:[%s2785_s13 + $0x20] sm:$0xff]  ;;  %v1248_v52 = vld [vmem:[%s2786_s14 + $0x10] sm:$0xff] }
 0x291   :  { %v2053_v28 = vpop.f32.mrf.mxu1 }
 0x292   :  { %v801_v34 = vadd.f32 %v2053_v28, %v2033_v22  ;;  %v864_v61 = vadd.f32 %v835_v56, %v786_v53  ;;  %v873_v1 = vmax.f32 %v865_v58, 0.0  ;;  %v904_v28 = vpop.permute.xlu1 %903  ;;  %v1249_v53 = vld [vmem:[%s2786_s14 + $0x18] sm:$0xff]  ;;  %v1252_v56 = vld [vmem:[%s2786_s14 + $0x30] sm:$0xff] }
 0x293   :  { %v795_v30 = vpop.f32.mrf.mxu1 }
 0x294   :  { %v796_v38 = vadd.f32 %v795_v30, %v666_v26  ;;  %v867_v47 = vadd.f32 %v850_v31, %v801_v34  ;;  %v872_v4 = vmax.f32 %v864_v61, 0.0  ;;  %v899_v26 = vpop.permute.xlu0 %898  ;;  %v1105_v31 = vld [vmem:[%s2785_s13] sm:$0xff] }
 0x295   :  { %v2056_v32 = vpop.f32.mrf.mxu1 }
 0x296   :  { %v811_v35 = vadd.f32 %v2056_v32, %v2036_v29  ;;  %v866_v54 = vadd.f32 %v845_v33, %v796_v38  ;;  %v875_v59 = vmax.f32 %v867_v47, 0.0  ;;  %v1245_v32 = vld [vmem:[%s2809_s7 + $0x18] sm:$0xff]  ;;  %v534_v38 = vadd.f32 %v2595_v13, %v2506_v43 }
 0x297   :  { %v805_v37 = vpop.f32.mrf.mxu1  ;;  %1444 = vmatprep.subr.mxu1 %v1245_v32  ;;  %v444_v47 = vadd.f32 %v2508_v44, %v2510_v45  ;;  %v1108_v13 = vld [vmem:[%s2785_s13 + $0x18] sm:$0xff]  ;;  %v519_v44 = vadd.f32 %v2593_v12, %v2517_v51  ;;  %v432_v45 = vadd.f32 %v2502_v39, %v2517_v51  ;;  %v1246_v51 = vld [vmem:[%s2786_s14] sm:$0xff]  ;;  %v1243_v12 = vld [vmem:[%s2809_s7 + $0x8] sm:$0xff] }
 0x298   :  { %v869_v40 = vadd.f32 %v860_v24, %v811_v35  ;;  %v806_v42 = vadd.f32 %v805_v37, %v676_v36  ;;  %v874_v62 = vmax.f32 %v866_v54, 0.0  ;;  %v1106_v37 = vld [vmem:[%s2785_s13 + $0x8] sm:$0xff]  ;;  %v1112_v39 = vld [vmem:[%s2785_s13 + $0x38] sm:$0xff]  ;;  %v1250_v54 = vld [vmem:[%s2786_s14 + $0x20] sm:$0xff] }
 0x29a   :  { %v877_v48 = vmax.f32 %v869_v40, 0.0  ;;  %v868_v50 = vadd.f32 %v855_v27, %v806_v42  ;;  %v1107_v40 = vld [vmem:[%s2785_s13 + $0x10] sm:$0xff]  ;;  %v450_v42 = vadd.f32 %v2599_v18, %v2506_v43  ;;  %v524_v43 = vadd.f32 %v2591_v11, %v2514_v49  ;;  %v1110_v11 = vld [vmem:[%s2785_s13 + $0x28] sm:$0xff] }
 0x29b   :  { %v438_v18 = vadd.f32 %v2504_v41, %v2514_v49  ;;  %v1111_v41 = vld [vmem:[%s2785_s13 + $0x30] sm:$0xff] }
 0x29c   :  { %v876_v55 = vmax.f32 %v868_v50, 0.0  ;;  %2057 = vmatprep.subr.mxu0 %v877_v48  ;;  %v1244_v49 = vld [vmem:[%s2809_s7 + $0x10] sm:$0xff]  ;;  %v1247_v50 = vld [vmem:[%s2786_s14 + $0x8] sm:$0xff] }
 0x29d   :  { %2058 = vmatpush3.msra.mxu0 %v877_v48  ;;  %v1242_v48 = vld [vmem:[%s2809_s7] sm:$0xff] }
 0x29e   :  { %2059 = vmatprep.subr.mxu0 %v876_v55 }
 0x29f   :  { %2060 = vmatpush3.msra.mxu0 %v876_v55  ;;  %v1251_v55 = vld [vmem:[%s2786_s14 + $0x28] sm:$0xff] }
 0x2a0   :  { %2061 = vmatprep.subr.mxu0 %v875_v59 }
 0x2a1   :  { %2062 = vmatpush3.msra.mxu0 %v875_v59 }
 0x2a2   :  { %2063 = vmatprep.subr.mxu0 %v874_v62 }
 0x2a3   :  { %2064 = vmatpush3.msra.mxu0 %v874_v62 }
 0x2a4   :  { %2065 = vmatprep.subr.mxu0 %v873_v1 }
 0x2a5   :  { %2066 = vmatpush3.msra.mxu0 %v873_v1 }
 0x2a6   :  { %2067 = vmatprep.subr.mxu0 %v872_v4 }
 0x2a7   :  { %2068 = vmatpush3.msra.mxu0 %v872_v4 }
 0x2a8   :  { %2069 = vmatprep.subr.mxu0 %v871_v5 }
 0x2a9   :  { %2070 = vmatpush3.msra.mxu0 %v871_v5 }
 0x2aa   :  { %2071 = vmatprep.subr.mxu0 %v870_v7 }
 0x2ab   :  { %2072 = vmatpush3.msra.mxu0 %v870_v7 }
 0x2ac   :  { %2074 = vmatmul.mubr.msk.f32.vlgmr.msra.gmra.mxu0 %vm906_vm3, %v879_v8 }
 0x2ad   :  { %2076 = vmatprep.mubr.msk.f32.mxu0 %vm906_vm3, %v880_v9 }
 0x2b0   :  { %2077 = vmatmul.mubr.msk.f32.gmra.mxu0 %vm906_vm3, %v881_v10 }
 0x2b1   :  { %2125 = vmatprep.mubr.msk.f32.mxu0 %vm350_vm2, %v1105_v31 }
 0x36c   :  { %v2075_v20 = vpop.f32.mrf.mxu0 }
 0x36d   :  { %v991_v24 = vadd.f32 %v2075_v20, %v894_v21 }
 0x36e   :  { %v985_v22 = vpop.f32.mrf.mxu0 }
 0x36f   :  { %v986_v23 = vadd.f32 %v985_v22, %v889_v19 }
 0x370   :  { %v2078_v25 = vpop.f32.mrf.mxu0 }
 0x371   :  { %2111 = vmatprep.mubr.f32.mxu1 %v986_v23  ;;  %v1001_v30 = vadd.f32 %v2078_v25, %v904_v28 }
 0x372   :  { %v995_v27 = vpop.f32.mrf.mxu0  ;;  %2112 = vmatmul.mubr.f32.vlgmr.msra.gmra.mxu1 %v991_v24 }
 0x373   :  { %v996_v29 = vadd.f32 %v995_v27, %v899_v26  ;;  %1445 = vmatpush1.msra.mxu1 %v1244_v49 }
 0x374   :  { %1446 = vmatprep.subr.mxu1 %v1243_v12 }
 0x375   :  { %2114 = vmatprep.mubr.f32.mxu1 %v996_v29  ;;  %1447 = vmatpush1.msra.mxu1 %v1242_v48 }
 0x376   :  { %2115 = vmatmul.mubr.f32.gmra.mxu1 %v1001_v30 }
 0x377   :  { %1480 = vmatprep.mubr.f32.mxu1 %v2198_v6 }
 0x432   :  { %v2113_v33 = vpop.f32.mrf.mxu1 }
 0x434   :  { %v1086_v34 = vpop.f32.mrf.mxu1 }
 0x436   :  { %v2116_v35 = vpop.f32.mrf.mxu1 }
 0x437   :  { %2117 = vmatprep.subr.mxu0 %v2116_v35 }
 0x438   :  { %v1096_v36 = vpop.f32.mrf.mxu1  ;;  %2118 = vmatpush3.msra.mxu0 %v2116_v35  ;;  %v1570_v35 = vpop.permute.xlu1 %1569 }
 0x439   :  { %2119 = vmatprep.subr.mxu0 %v1096_v36 }
 0x43a   :  { %2120 = vmatpush3.msra.mxu0 %v1096_v36 }
 0x43b   :  { %2121 = vmatprep.subr.mxu0 %v2113_v33 }
 0x43c   :  { %2122 = vmatpush3.msra.mxu0 %v2113_v33  ;;  %v1575_v33 = vpop.permute.xlu0 %1574 }
 0x43d   :  { %2123 = vmatprep.subr.mxu0 %v1086_v34 }
 0x43e   :  { %2124 = vmatpush3.msra.mxu0 %v1086_v34 }
 0x43f   :  { %2126 = vmatmul.mubr.msk.f32.vlgmr.msra.gmra.mxu0 %vm350_vm2, %v1106_v37  ;;  %1302 = vmatprep.subr.mxu0 %v534_v38 }
 0x440   :  { %1303 = vmatpush1.msra.mxu0 %v450_v42  ;;  %2128 = vmatprep.mubr.msk.f32.mxu0 %vm350_vm2, %v1107_v40  ;;  %v1565_v40 = vpop.permute.xlu0 %1564 }
 0x441   :  { %1304 = vmatprep.subr.mxu0 %v529_v46 }
 0x442   :  { %1305 = vmatpush1.msra.mxu0 %v444_v47 }
 0x443   :  { %1306 = vmatprep.subr.mxu0 %v524_v43  ;;  %2129 = vmatmul.mubr.msk.f32.gmra.mxu0 %vm350_vm2, %v1108_v13 }
 0x444   :  { %1307 = vmatpush1.msra.mxu0 %v438_v18  ;;  %2131 = vmatprep.mubr.msk.f32.mxu0 %vm350_vm2, %v1109_v14 }
 0x445   :  { %1308 = vmatprep.subr.mxu0 %v519_v44  ;;  %v1560_v44 = vpop.permute.xlu1 %1559 }
 0x446   :  { %1309 = vmatpush1.msra.mxu0 %v432_v45 }
 0x447   :  { %2132 = vmatmul.mubr.msk.f32.gmra.mxu0 %vm350_vm2, %v1110_v11 }
 0x448   :  { %2134 = vmatprep.mubr.msk.f32.mxu0 %vm350_vm2, %v1111_v41 }
 0x44b   :  { %2135 = vmatmul.mubr.msk.f32.gmra.mxu0 %vm350_vm2, %v1112_v39 }
 0x44c   :  { %1342 = vmatprep.mubr.f32.mxu0 %v2198_v6 }
 0x44f   :  { %1903 = vmatmul.mubr.msk.f32.vlgmr.msra.gmra.mxu0 %vm350_vm2, %v1246_v51 }
 0x450   :  { %1348 = vmatprep.mubr.f32.mxu0 %v2198_v6 }
 0x453   :  { %1904 = vmatmul.mubr.msk.f32.gmra.mxu0 %vm350_vm2, %v1247_v50 }
 0x454   :  { %1354 = vmatprep.mubr.f32.mxu0 %v2198_v6 }
 0x457   :  { %1905 = vmatmul.mubr.msk.f32.gmra.mxu0 %vm350_vm2, %v1248_v52 }
 0x458   :  { %1360 = vmatprep.mubr.f32.mxu0 %v2198_v6 }
 0x45b   :  { %1906 = vmatmul.mubr.msk.f32.gmra.mxu0 %vm350_vm2, %v1249_v53  ;;  %v1555_v53 = vpop.permute.xlu0 %1554 }
 0x45c   :  { %1366 = vmatprep.mubr.f32.mxu0 %v2198_v6 }
 0x45f   :  { %1907 = vmatmul.mubr.msk.f32.gmra.mxu0 %vm350_vm2, %v1250_v54 }
 0x460   :  { %1372 = vmatprep.mubr.f32.mxu0 %v2198_v6 }
 0x463   :  { %1908 = vmatmul.mubr.msk.f32.gmra.mxu0 %vm350_vm2, %v1251_v55 }
 0x464   :  { %1378 = vmatprep.mubr.f32.mxu0 %v2198_v6 }
 0x467   :  { %1909 = vmatmul.mubr.msk.f32.gmra.mxu0 %vm350_vm2, %v1252_v56 }
 0x468   :  { %1384 = vmatprep.mubr.f32.mxu0 %v2198_v6 }
 0x46b   :  { %1910 = vmatmul.mubr.msk.f32.gmra.mxu0 %vm350_vm2, %v1253_v57 }
 0x46c   :  { %1683 = vmatprep.mubr.f32.mxu0 %v2198_v6 }
 0x4ff   :  { %v2127_v58 = vpop.f32.mrf.mxu0 }
 0x501   :  { %v1203_v59 = vpop.f32.mrf.mxu0 }
 0x502   :  { %1911 = vmatmul.mubr.msk.f32.vlgmr.msra.gmra.mxu1 %vm1391_vm4, %v1203_v59 }
 0x503   :  { %1486 = vmatprep.mubr.f32.mxu1 %v2198_v6  ;;  %v2130_v60 = vpop.f32.mrf.mxu0 }
 0x505   :  { %v1213_v61 = vpop.f32.mrf.mxu0 }
 0x506   :  { %1912 = vmatmul.mubr.msk.f32.gmra.mxu1 %vm1391_vm4, %v2127_v58 }
 0x507   :  { %1492 = vmatprep.mubr.f32.mxu1 %v2198_v6  ;;  %v2133_v62 = vpop.f32.mrf.mxu0 }
 0x509   :  { %v1223_v63 = vpop.f32.mrf.mxu0 }
 0x50a   :  { %1913 = vmatmul.mubr.msk.f32.gmra.mxu1 %vm1391_vm4, %v1213_v61 }
 0x50b   :  { %1498 = vmatprep.mubr.f32.mxu1 %v2198_v6  ;;  %v2136_v0 = vpop.f32.mrf.mxu0 }
 0x50d   :  { %v1233_v1 = vpop.f32.mrf.mxu0 }
 0x50e   :  { %1914 = vmatmul.mubr.msk.f32.gmra.mxu1 %vm1391_vm4, %v2130_v60  ;;  %v1550_v60 = vpop.permute.xlu1 %1549 }
 0x50f   :  { %1504 = vmatprep.mubr.f32.mxu1 %v2198_v6  ;;  %v2740_v2 = vpop.f32.mrf.mxu0 }
 0x511   :  { %v2742_v3 = vpop.f32.mrf.mxu0 }
 0x512   :  { %1915 = vmatmul.mubr.msk.f32.gmra.mxu1 %vm1391_vm4, %v1223_v63 }
 0x513   :  { %1510 = vmatprep.mubr.f32.mxu1 %v2198_v6  ;;  %v2744_v4 = vpop.f32.mrf.mxu0 }
 0x515   :  { %v2746_v5 = vpop.f32.mrf.mxu0 }
 0x516   :  { %1916 = vmatmul.mubr.msk.f32.gmra.mxu1 %vm1391_vm4, %v2133_v62 }
 0x517   :  { %1516 = vmatprep.mubr.f32.mxu1 %v2198_v6  ;;  %v1356_v7 = vpop.f32.mrf.mxu0 }
 0x519   :  { %v1358_v8 = vpop.f32.mrf.mxu0 }
 0x51a   :  { %1917 = vmatmul.mubr.msk.f32.gmra.mxu1 %vm1391_vm4, %v1233_v1 }
 0x51b   :  { %1522 = vmatprep.mubr.f32.mxu1 %v2198_v6  ;;  %v1362_v9 = vpop.f32.mrf.mxu0 }
 0x51d   :  { %v1364_v10 = vpop.f32.mrf.mxu0 }
 0x51e   :  { %1918 = vmatmul.mubr.msk.f32.gmra.mxu1 %vm1391_vm4, %v2136_v0 }
 0x51f   :  { %1776 = vmatprep.mubr.f32.mxu1 %v2198_v6  ;;  %v1368_v17 = vpop.f32.mrf.mxu0 }
 0x521   :  { %v1370_v6 = vpop.f32.mrf.mxu0 }
 0x523   :  { %v1374_v23 = vpop.f32.mrf.mxu0 }
 0x525   :  { %v1376_v26 = vpop.f32.mrf.mxu0 }
 0x527   :  { %v1380_v29 = vpop.f32.mrf.mxu0 }
 0x529   :  { %v1382_v32 = vpop.f32.mrf.mxu0 }
 0x52b   :  { %v1386_v36 = vpop.f32.mrf.mxu0 }
 0x52d   :  { %v1388_v13 = vpop.f32.mrf.mxu0 }
 0x5c2   :  { %v2748_v15 = vpop.f32.mrf.mxu1 }
 0x5c4   :  { %v2750_v16 = vpop.f32.mrf.mxu1 }
 0x5c6   :  { %v1488_v19 = vpop.f32.mrf.mxu1 }
 0x5c8   :  { %v1490_v20 = vpop.f32.mrf.mxu1 }
 0x5c9   :  { %v1491_v0 = vadd.f32 %v1490_v20, %v2746_v5  ;;  %v1483_v5 = vadd.f32 %v2748_v15, %v2740_v2 }
 0x5ca   :  { %v1494_v21 = vpop.f32.mrf.mxu1 }
 0x5cb   :  { %v1495_v61 = vadd.f32 %v1494_v21, %v1356_v7 }
 0x5cc   :  { %v1496_v22 = vpop.f32.mrf.mxu1 }
 0x5cd   :  { %v1497_v57 = vadd.f32 %v1496_v22, %v1358_v8  ;;  %v1545_v22 = vpop.permute.xlu0 %1544  ;;  %v1581_v20 = vadd.f32 %v1550_v60, %v1495_v61 }
 0x5ce   :  { %v1500_v24 = vpop.f32.mrf.mxu1 }
 0x5cf   :  { %v1501_v54 = vadd.f32 %v1500_v24, %v1362_v9  ;;  %v1489_v9 = vadd.f32 %v1488_v19, %v2744_v4  ;;  %v1582_v7 = vadd.f32 %v1550_v60, %v1497_v57  ;;  %v1580_v4 = vadd.f32 %v1545_v22, %v1491_v0  ;;  %v1540_v24 = vpop.permute.xlu1 %1539 }
 0x5d0   :  { %v1502_v25 = vpop.f32.mrf.mxu1 }
 0x5d1   :  { %v1503_v48 = vadd.f32 %v1502_v25, %v1364_v10  ;;  %v1579_v25 = vadd.f32 %v1545_v22, %v1489_v9  ;;  %v1596_v2 = vmax.f32 %v1580_v4, 0.0 }
 0x5d2   :  { %v1506_v27 = vpop.f32.mrf.mxu1 }
 0x5d3   :  { %v1507_v51 = vadd.f32 %v1506_v27, %v1368_v17  ;;  %v1584_v1 = vadd.f32 %v1555_v53, %v1503_v48  ;;  %v1583_v17 = vadd.f32 %v1555_v53, %v1501_v54  ;;  %v1577_v27 = vadd.f32 %v1540_v24, %v1483_v5 }
 0x5d4   :  { %v1508_v28 = vpop.f32.mrf.mxu1  ;;  %v1595_v15 = vmax.f32 %v1579_v25, 0.0 }
 0x5d5   :  { %v1509_v41 = vadd.f32 %v1508_v28, %v1370_v6  ;;  %v1585_v62 = vadd.f32 %v1560_v44, %v1507_v51  ;;  %v1485_v6 = vadd.f32 %v2750_v16, %v2742_v3  ;;  %v1600_v19 = vmax.f32 %v1584_v1, 0.0 }
 0x5d6   :  { %v1512_v30 = vpop.f32.mrf.mxu1  ;;  %v1598_v16 = vmax.f32 %v1582_v7, 0.0  ;;  %v1597_v28 = vmax.f32 %v1581_v20, 0.0 }
 0x5d7   :  { %v1513_v45 = vadd.f32 %v1512_v30, %v1374_v23  ;;  %v1586_v58 = vadd.f32 %v1560_v44, %v1509_v41  ;;  %v1601_v23 = vmax.f32 %v1585_v62, 0.0  ;;  %v1578_v3 = vadd.f32 %v1540_v24, %v1485_v6 }
 0x5d8   :  { %v1514_v31 = vpop.f32.mrf.mxu1  ;;  %v1593_v30 = vmax.f32 %v1577_v27, 0.0 }
 0x5d9   :  { %v1515_v14 = vadd.f32 %v1514_v31, %v1376_v26  ;;  %v1587_v55 = vadd.f32 %v1565_v40, %v1513_v45  ;;  %v1602_v21 = vmax.f32 %v1586_v58, 0.0  ;;  %v1599_v26 = vmax.f32 %v1583_v17, 0.0  ;;  %v1609_v31 = vld [vmem:[%s2788_s16] sm:$0x3]  ;;  %s2200_s16 = smov [#allocation2]  }
 0x5da   :  { %v1518_v34 = vpop.f32.mrf.mxu1  ;;  %s1833_s23 = sshll.u32 %s2200_s16, 4  ;;  %s1834_s23 = int_to_ptr.vmem [resolvable:$true] %s1833_s23 }
 0x5db   :  { %v1519_v47 = vadd.f32 %v1518_v34, %v1380_v29  ;;  %v1588_v50 = vadd.f32 %v1565_v40, %v1515_v14  ;;  %v1603_v8 = vmax.f32 %v1587_v55, 0.0  ;;  %v1594_v29 = vmax.f32 %v1578_v3, 0.0  ;;  %p2158_p1 = scmp.lt.s32.totalorder %s1834_s23, %s1834_s23 }
 0x5dc   :  { %v1520_v37 = vpop.f32.mrf.mxu1 }
 0x5dd   :  { %v1521_v42 = vadd.f32 %v1520_v37, %v1382_v32  ;;  %v1589_v12 = vadd.f32 %v1570_v35, %v1519_v47  ;;  %v1604_v10 = vmax.f32 %v1588_v50, 0.0  ;;  %v1702_v32 = vld [vmem:[%s2790_s18] sm:$0x3]  ;;  %s2153_s18 = scalar_lea.vmem %s1834_s23, 64 }
 0x5de   :  { %v1524_v38 = vpop.f32.mrf.mxu1  ;;  %p2154_p0 = scmp.ne.s32.totalorder %s1834_s23, %s2153_s18  ;;  %p2159_p2 = scmp.lt.s32.totalorder %s2153_s18, %s2153_s18 }
 0x5df   :  { %v1525_v46 = vadd.f32 %v1524_v38, %v1386_v36  ;;  %v1590_v39 = vadd.f32 %v1570_v35, %v1521_v42  ;;  %v1605_v63 = vmax.f32 %v1589_v12, 0.0  ;;  %v1614_v36 = vpop.permute.xlu1 %1613 }
 0x5e0   :  { %v1526_v43 = vpop.f32.mrf.mxu1  ;;  %p2160_p3 = por %p2159_p2, %p2158_p1 }
 0x5e1   :  { %v1527_v18 = vadd.f32 %v1526_v43, %v1388_v13  ;;  %v1591_v11 = vadd.f32 %v1575_v33, %v1525_v46  ;;  %v1606_v59 = vmax.f32 %v1590_v39, 0.0 }
 0x5e2   :  { %p2161_p4 = pnand %p2160_p3, %p2154_p0 }
 0x5e3   :  { %v1592_v49 = vadd.f32 %v1575_v33, %v1527_v18  ;;  %v1607_v56 = vmax.f32 %v1591_v11, 0.0  ;;  %v1707_v33 = vpop.permute.xlu0 %1706 }
 0x5e5   :  { %v1608_v52 = vmax.f32 %v1592_v49, 0.0 }
 0x5e7   :  { %1635 = vmatprep.subr.mxu0 %v1608_v52  ;;  %1728 = vmatprep.subr.mxu1 %v1608_v52 }
 0x5e8   :  { %1636 = vmatpush1.msra.mxu0 %v1607_v56  ;;  %1729 = vmatpush1.msra.mxu1 %v1607_v56 }
 0x5e9   :  { %1637 = vmatprep.subr.mxu0 %v1606_v59  ;;  %1730 = vmatprep.subr.mxu1 %v1606_v59 }
 0x5ea   :  { %1638 = vmatpush1.msra.mxu0 %v1605_v63  ;;  %1731 = vmatpush1.msra.mxu1 %v1605_v63 }
 0x5eb   :  { %1639 = vmatprep.subr.mxu0 %v1604_v10  ;;  %1732 = vmatprep.subr.mxu1 %v1604_v10 }
 0x5ec   :  { %1640 = vmatpush1.msra.mxu0 %v1603_v8  ;;  %1733 = vmatpush1.msra.mxu1 %v1603_v8 }
 0x5ed   :  { %1641 = vmatprep.subr.mxu0 %v1602_v21  ;;  %1734 = vmatprep.subr.mxu1 %v1602_v21 }
 0x5ee   :  { %1642 = vmatpush1.msra.mxu0 %v1601_v23  ;;  %1735 = vmatpush1.msra.mxu1 %v1601_v23 }
 0x5ef   :  { %1643 = vmatprep.subr.mxu0 %v1600_v19  ;;  %1736 = vmatprep.subr.mxu1 %v1600_v19 }
 0x5f0   :  { %1644 = vmatpush1.msra.mxu0 %v1599_v26  ;;  %1737 = vmatpush1.msra.mxu1 %v1599_v26 }
 0x5f1   :  { %1645 = vmatprep.subr.mxu0 %v1598_v16  ;;  %1738 = vmatprep.subr.mxu1 %v1598_v16 }
 0x5f2   :  { %1646 = vmatpush1.msra.mxu0 %v1597_v28  ;;  %1739 = vmatpush1.msra.mxu1 %v1597_v28 }
 0x5f3   :  { %1647 = vmatprep.subr.mxu0 %v1596_v2  ;;  %1740 = vmatprep.subr.mxu1 %v1596_v2 }
 0x5f4   :  { %1648 = vmatpush1.msra.mxu0 %v1595_v15  ;;  %1741 = vmatpush1.msra.mxu1 %v1595_v15 }
 0x5f5   :  { %1649 = vmatprep.subr.mxu0 %v1594_v29  ;;  %1742 = vmatprep.subr.mxu1 %v1594_v29 }
 0x5f6   :  { %1650 = vmatpush1.msra.mxu0 %v1593_v30  ;;  %1743 = vmatpush1.msra.mxu1 %v1593_v30 }
 0x5f7   :  { %1919 = vmatmul.mubr.msk.f32.vlgmr.msra.gmra.mxu0 %vm906_vm3, %v1609_v31  ;;  %1921 = vmatmul.mubr.msk.f32.vlgmr.msra.gmra.mxu1 %vm906_vm3, %v1702_v32 }
 0x6b7   :  { %v1685_v34 = vpop.f32.mrf.mxu0  ;;  %v1778_v35 = vpop.f32.mrf.mxu1 }
 0x6b8   :  { %v1779_v37 = vadd.f32 %v1778_v35, %v1707_v33  ;;  %v1686_v42 = vadd.f32 %v1685_v34, %v1614_v36 }
 0x6b9   :  { %v1687_v38 = vpop.f32.mrf.mxu0  ;;  %v1780_v40 = vpop.f32.mrf.mxu1 }
 0x6ba   :  { %v1783_v46 = vand.u32 2147483647, %v1779_v37  ;;  %v1688_v47 = vadd.f32 %v1687_v38, %v1614_v36  ;;  %v1781_v13 = vadd.f32 %v1780_v40, %v1707_v33 }
 0x6bc   :  { %v1785_v43 = vsub.f32 0.0, %v1783_v46  ;;  %v1784_v14 = vand.u32 2147483647, %v1781_v13  ;;  %v1692_v18 = vcombine.low %v1686_v42, %v1688_v47 }
 0x6be   :  { %v1787_v44 = vmul.f32 1.442695, %v1785_v43  ;;  %v1786_v45 = vsub.f32 0.0, %v1784_v14 }
 0x6bf   :  { %1920 = vst.sshfl [vmem:[#allocation2] sm:$0x33 pattern:$0x76325410] %v1692_v18 }
 0x6c0   :  { %2164 = shalt.err (!%p2161_p4)
}
 0x6c1   :  { %1836 = dma.vmem_to_hbm [thread:$0]  %s1834_s23, 64, %s2792_s20, [#allocation3]   ;;  %2145 = vpow2.f32 %v1787_v44  ;;  %v1789_v11 = vmul.f32 1.442695, %v1786_v45  ;;  %v1809_v59 = vmax.f32 %v1779_v37, 0.0  ;;  %v1810_v0 = vmax.f32 %v1781_v13, 0.0 }
 0x6c2   :  { %s2201_s20 = smov [#allocation4]  }
 0x6c3   :  { %2147 = vpow2.f32 %v1789_v11  ;;  %s1843_s12 = sshll.u32 %s2201_s20, 4  ;;  %s1844_s12 = int_to_ptr.vmem [resolvable:$true] %s1843_s12 }
 0x6c4   :  { %s2173_s24 = scalar_lea.vmem %s1844_s12, 64  ;;  %p2178_p6 = scmp.lt.s32.totalorder %s1844_s12, %s1844_s12 }
 0x6c5   :  { %p2174_p5 = scmp.ne.s32.totalorder %s1844_s12, %s2173_s24  ;;  %p2179_p7 = scmp.lt.s32.totalorder %s2173_s24, %s2173_s24 }
 0x6c7   :  { %p2180_p8 = por %p2179_p7, %p2178_p6 }
 0x6c9   :  { %p2181_p9 = pnand %p2180_p8, %p2174_p5 }
 0x6ce   :  { %v2146_v41 = vpop.eup %2145 }
 0x6cf   :  { %v1791_v39 = vadd.f32 1.0, %v2146_v41  ;;  %v1794_v12 = vmul.f32 -0.5, %v2146_v41  ;;  %v1797_v52 = vand.u32 2147483647, %v2146_v41 }
 0x6d0   :  { %v2148_v49 = vpop.eup %2147 }
 0x6d1   :  { %2149 = vlog2.f32 %v1791_v39  ;;  %v1800_v51 = vadd.f32 1.0, %v2148_v49  ;;  %v1803_v48 = vmul.f32 -0.5, %v2148_v49  ;;  %v1795_v50 = vadd.f32 1.0, %v1794_v12 }
 0x6d2   :  { %v1806_v55 = vand.u32 2147483647, %v2148_v49  ;;  %vm1798_vm5 = vcmp.lt.f32.partialorder %v1797_v52, 0.0004427343 }
 0x6d3   :  { %2151 = vlog2.f32 %v1800_v51  ;;  %v1804_v53 = vadd.f32 1.0, %v1803_v48  ;;  %v1796_v57 = vmul.f32 %v2146_v41, %v1795_v50 }
 0x6d4   :  { %vm1807_vm6 = vcmp.lt.f32.partialorder %v1806_v55, 0.0004427343 }
 0x6d5   :  { %v1805_v62 = vmul.f32 %v2148_v49, %v1804_v53 }
 0x6de   :  { %v2150_v54 = vpop.eup %2149 }
 0x6df   :  { %v1793_v56 = vmul.f32 0.6931472, %v2150_v54 }
 0x6e0   :  { %v2152_v58 = vpop.eup %2151 }
 0x6e1   :  { %v1799_v60 = vsel %vm1798_vm5, %v1796_v57, %v1793_v56  ;;  %v1802_v61 = vmul.f32 0.6931472, %v2152_v58 }
 0x6e2   :  { %v1811_v63 = vadd.f32 %v1809_v59, %v1799_v60 }
 0x6e3   :  { %v1808_v1 = vsel %vm1807_vm6, %v1805_v62, %v1802_v61 }
 0x6e4   :  { %v1812_v10 = vadd.f32 %v1810_v0, %v1808_v1  ;;  %v1813_v9 = vadd.f32 0.001, %v1811_v63 }
 0x6e6   :  { %v1814_v17 = vadd.f32 0.001, %v1812_v10 }
 0x6e8   :  { %v1817_v8 = vcombine.low %v1813_v9, %v1814_v17 }
 0x6ea   :  { %1922 = vst.sshfl [vmem:[#allocation4] sm:$0x33 pattern:$0x76325410] %v1817_v8 }
 0x6eb   :  { %2184 = shalt.err (!%p2181_p9)
}
 0x6ec   :  { %1846 = dma.vmem_to_hbm [thread:$0]  %s1844_s12, 64, %s2793_s21, [#allocation5]  }
 0x6ed   :  { %2193 = dma.done.wait [#allocation3], 64  }
 0x6ee   :  { %2194 = vsyncadd [#allocation3], 4294967232 }
 0x6ef   :  { %2195 = dma.done.wait [#allocation5], 64  }
 0x6f0   :  { %2196 = vsyncadd [#allocation5], 4294967232 }
 0x6f1   :  { %1853 = vsyncpa [#allocation3], 1 }
 0x6f2   :  { %1854 = vsyncpa [#allocation5], 1 }

</bundles_post_ra>
